<compile_context>
chip_gen: v7x
topology: tpu7x:2x2x1
jax: 0.10.0
libtpu: 0.0.40
codegen_flags: <defaults>
</compile_context>

<pallas_src>
from functools import partial
import math

import jax
import jax.numpy as jnp
import numpy as np
from jax.experimental import pallas as pl
from jax.experimental.pallas import tpu as pltpu


# ----------------------------------------------------------------- fused kernel
def _expand_norm_kernel(x_ref, w_ref, g_ref, gamma_ref, beta_ref, o_ref, *,
                        c_out, fc, n_p1, eps):
    """One row tile: expand matmul for n_p1 p1-slices + per-pixel LayerNorm, bulk store.

    x_ref     : (th, W, C)            input rows, native dtype
    w_ref     : (C, n_p1*fc)  bf16    expand weight slice(s); columns ordered (p1, p2, c)
    g_ref     : (fc, fc)      bf16    block-diag ones -> MXU group-sum over each c_out lane group
    gamma_ref : (1, fc)       f32     LN weight tiled over p2
    beta_ref  : (1, fc)       f32     LN bias   tiled over p2
    o_ref     : (th, W, fc)           if n_p1 == 1 (p1 handled by the grid)
                (th, n_p1, W, fc)     if n_p1 > 1 (all p1 slices fused)
    """
    th, W, C = x_ref.shape
    rows = th * W

    # Leading-dim merge only (last dim untouched); wrapper guarantees W is a multiple of the
    # input dtype's sublane tile (or th == 1), so this is layout-preserving. bf16 cast AFTER it.
    x2 = x_ref[...].reshape(rows, C).astype(jnp.bfloat16)

    # Expand matmul for all n_p1 slices in one MXU pass (bf16 in, f32 accumulate).
    r_all = jnp.dot(x2, w_ref[...], preferred_element_type=jnp.float32)   # (rows, n_p1*fc)

    g = g_ref[...]
    gam = gamma_ref[...]
    bet = beta_ref[...]
    inv_c = 1.0 / float(c_out)

    for p in range(n_p1):                                    # static unroll (1 or dim_scale)
        # 128-aligned static column slice when n_p1 > 1 (wrapper only fuses if fc % 128 == 0).
        r = r_all[:, p * fc:(p + 1) * fc] if n_p1 > 1 else r_all

        # LayerNorm stats over each c_out-lane group via two independent MXU group-sum matmuls
        # (no mean -> var serialization through the MXU result path).
        s1 = jnp.dot(r.astype(jnp.bfloat16), g, preferred_element_type=jnp.float32)
        s2 = jnp.dot((r * r).astype(jnp.bfloat16), g, preferred_element_type=jnp.float32)
        mean = s1 * inv_c
        # E[x^2] - mean^2: slightly less stable than the centered form, fine at LN scales.
        var = jnp.maximum(s2 * inv_c - mean * mean, 0.0)

        yn = (r - mean) * jax.lax.rsqrt(var + eps) * gam + bet

        if n_p1 > 1:
            o_ref[:, p, :, :] = yn.reshape(th, W, fc).astype(o_ref.dtype)
        else:
            o_ref[...] = yn.reshape(th, W, fc).astype(o_ref.dtype)


# --------------------------------------------------------------------- helpers
def _vmem_capacity_bytes():
    try:
        cap = getattr(pltpu.get_tpu_info(), "vmem_capacity_bytes", None)
        if cap:
            return int(cap)
    except Exception:
        pass
    return 64 << 20          # conservative fallback (v7x physical VMEM)


def _largest_divisor_leq(n, cap):
    cap = max(1, min(n, cap))
    best, d = 1, 1
    while d * d <= n:
        if n % d == 0:
            if d <= cap:
                best = max(best, d)
            q = n // d
            if q <= cap:
                best = max(best, q)
        d += 1
    return best


# --------------------------------------------------------------------- wrapper
def final_patch_expand2d(x, w_t, gamma, beta, *, dim_scale=4, eps=1e-5):
    """x: (B, H, W, C); w_t = expand.weight.T: (C, dim_scale*C); gamma/beta: (C//dim_scale,)."""
    B, H, W, C = x.shape
    assert C % dim_scale == 0
    c_out = C // dim_scale
    fc = dim_scale * c_out                     # == C; lane width of one p1 output slice
    BH = B * H
    out_dtype = x.dtype                        # keep the model's native dtype (no forced f32)

    # ---- parameters in kernel-friendly layouts (tiny one-time cost) ----
    fuse_p1 = (fc % 128 == 0)                  # static column slices are free only if 128-aligned
    n_p1 = dim_scale if fuse_p1 else 1
    if fuse_p1:
        w_arg = w_t.astype(jnp.bfloat16)                                       # (C, dim_scale*fc)
    else:
        # per-p1 weight slices: w_t columns are ordered (p1, p2, c)
        w_arg = jnp.transpose(w_t.astype(jnp.bfloat16).reshape(C, dim_scale, fc),
                              (1, 0, 2))                                        # (dim_scale, C, fc)
    # group-sum matrix (0/1 -> exact in bf16) + LN affine params tiled over p2
    g = jnp.kron(jnp.eye(dim_scale, dtype=jnp.float32),
                 jnp.ones((c_out, c_out), jnp.float32)).astype(jnp.bfloat16)    # (fc, fc)
    gamma_t = jnp.tile(gamma.astype(jnp.float32), dim_scale).reshape(1, fc)
    beta_t = jnp.tile(beta.astype(jnp.float32), dim_scale).reshape(1, fc)

    x3 = x.reshape(BH, W, C)                   # contiguous -> free; no dtype change

    # ---- row-tile selection: as large as the per-step VMEM budget allows ----
    vmem_cap = _vmem_capacity_bytes()
    vmem_limit = int(min(vmem_cap * 3 // 4, 96 << 20))   # ~48 MiB on v7x, 96 MiB on v5e/v6e
    budget = vmem_limit // 2                             # per-step working-set target

    xb = x.dtype.itemsize
    ob = jnp.dtype(out_dtype).itemsize
    # bytes per matmul row: double-buffered x/out blocks + f32/bf16 temporaries
    row_bytes = 2 * C * xb + 2 * n_p1 * fc * ob + 4 * n_p1 * fc + 2 * C + 32 * fc
    max_rows = max(8, budget // row_bytes)

    sub = {4: 8, 2: 16, 1: 32}.get(xb, 8)      # sublane tile of the input dtype
    if W % sub == 0 and W % 8 == 0:
        max_th = min(BH, max(1, max_rows // W))
        if BH >= 2:
            max_th = min(max_th, BH // 2)      # keep >= 2 row tiles so both v7x TCs get work
        th = _largest_divisor_leq(BH, max_th)
    else:
        th = 1                                 # keeps in-kernel reshapes layout-preserving
    n_row_tiles = BH // th

    # ---- grid + specs ----
    kernel = partial(_expand_norm_kernel, c_out=c_out, fc=fc, n_p1=n_p1, eps=eps)
    if fuse_p1:
        grid = (n_row_tiles,)
        in_specs = [
            pl.BlockSpec((th, W, C), lambda i: (i, 0, 0)),
            pl.BlockSpec((C, dim_scale * fc), lambda i: (0, 0)),
            pl.BlockSpec((fc, fc), lambda i: (0, 0)),
            pl.BlockSpec((1, fc), lambda i: (0, 0)),
            pl.BlockSpec((1, fc), lambda i: (0, 0)),
        ]
        out_specs = pl.BlockSpec((th, dim_scale, W, fc), lambda i: (i, 0, 0, 0))
        dims = ("parallel",)
    else:
        grid = (n_row_tiles, dim_scale)        # p1 innermost -> x block DMA'd once, reused
        in_specs = [
            pl.BlockSpec((th, W, C), lambda i, p: (i, 0, 0)),
            pl.BlockSpec((None, C, fc), lambda i, p: (p, 0, 0)),
            pl.BlockSpec((fc, fc), lambda i, p: (0, 0)),
            pl.BlockSpec((1, fc), lambda i, p: (0, 0)),
            pl.BlockSpec((1, fc), lambda i, p: (0, 0)),
        ]
        out_specs = pl.BlockSpec((th, None, W, fc), lambda i, p: (i, p, 0, 0))
        dims = ("parallel", "arbitrary")

    M = BH * W
    flops = 2 * M * C * dim_scale * fc + 2 * (2 * M * dim_scale * fc * fc)
    bytes_accessed = (M * C * xb + dim_scale * C * fc * 2
                      + M * dim_scale * fc * ob + fc * fc * 2 + 2 * 4 * fc)

    out = pl.pallas_call(
        kernel,
        out_shape=jax.ShapeDtypeStruct((BH, dim_scale, W, fc), out_dtype),
        grid=grid,
        in_specs=in_specs,
        out_specs=out_specs,
        compiler_params=pltpu.CompilerParams(
            dimension_semantics=dims,
            vmem_limit_bytes=vmem_limit),
        cost_estimate=pl.CostEstimate(flops=flops,
                                      transcendentals=M * dim_scale * fc,
                                      bytes_accessed=bytes_accessed),
    )(x3, w_arg, g, gamma_t, beta_t)

    # (BH, p1, W, p2*c_out) already matches 'b (h p1) (w p2) c' element order -> free reshape
    return out.reshape(B, H * dim_scale, W * dim_scale, c_out)


# -------------------------------------------------------------- pure-JAX reference
def ref_forward(x, w_t, gamma, beta, *, dim_scale=4, eps=1e-5):
    B, H, W, C = x.shape
    c_out = C // dim_scale
    y = x.reshape(-1, C).astype(jnp.float32) @ w_t.astype(jnp.float32)
    y = y.reshape(B, H, W, dim_scale, dim_scale, c_out)
    y = jnp.transpose(y, (0, 1, 3, 2, 4, 5)).reshape(
        B, H * dim_scale, W * dim_scale, c_out)
    mean = jnp.mean(y, axis=-1, keepdims=True)
    var = jnp.mean(jnp.square(y - mean), axis=-1, keepdims=True)
    return (y - mean) * jax.lax.rsqrt(var + eps) * gamma + beta


def _run_case(key, B, H, W, C, dim_scale):
    kx, kw, kg, kb = jax.random.split(key, 4)
    x = jax.random.normal(kx, (B, H, W, C), jnp.float32)
    # torch nn.Linear(dim, dim_scale*dim, bias=False).weight has shape (dim_scale*dim, dim)
    w = jax.random.normal(kw, (dim_scale * C, C), jnp.float32) / math.sqrt(C)
    w_t = w.T                                                  # (C, dim_scale*C)
    gamma = 1.0 + 0.1 * jax.random.normal(kg, (C // dim_scale,), jnp.float32)
    beta = 0.1 * jax.random.normal(kb, (C // dim_scale,), jnp.float32)

    out = jax.jit(partial(final_patch_expand2d, dim_scale=dim_scale))(x, w_t, gamma, beta)
    out = jax.block_until_ready(out)
    assert out.shape == (B, H * dim_scale, W * dim_scale, C // dim_scale)

    ref = ref_forward(x, w_t, gamma, beta, dim_scale=dim_scale)
    np.testing.assert_allclose(np.asarray(out), np.asarray(ref), rtol=3e-2, atol=3e-2)


if __name__ == "__main__":
    key = jax.random.PRNGKey(0)
    k1, k2 = jax.random.split(key)
    # Case 1: C = 32 (fc < 128 -> per-p1 grid path). Output (2, 64, 64, 8).
    _run_case(k1, B=2, H=16, W=16, C=32, dim_scale=4)
    # Case 2: C = 128 (fc % 128 == 0 -> fused single-matmul path). Output (1, 32, 32, 32).
    _run_case(k2, B=1, H=8, W=8, C=128, dim_scale=4)
    print("KERNEL_OK")
</pallas_src>

<mosaic_0001>
module attributes {stable_mosaic.version = 11 : i64} {
  func.func @_expand_norm_kernel(%arg0: i32, %arg1: i32, %arg2: memref<16x16x32xf32, #tpu.memory_space<vmem>>, %arg3: memref<1x32x32xbf16, #tpu.memory_space<vmem>>, %arg4: memref<32x32xbf16, #tpu.memory_space<vmem>>, %arg5: memref<1x32xf32, #tpu.memory_space<vmem>>, %arg6: memref<1x32xf32, #tpu.memory_space<vmem>>, %arg7: memref<16x1x16x32xf32, #tpu.memory_space<vmem>>) attributes {dimension_semantics = [#tpu.dimension_semantics<parallel>, #tpu.dimension_semantics<arbitrary>], iteration_bounds = array<i64: 2, 4>, scalar_prefetch = 0 : i64, scratch_operands = 0 : i64, tpu.core_type = #tpu.core_type<tc>, window_params = [{transform_indices = @transform_0, window_bounds = array<i64: 16, 16, 32>}, {transform_indices = @transform_1, window_bounds = array<i64: 1, 32, 32>}, {pipeline_mode = #tpu.pipeline_mode<synchronous>, transform_indices = @transform_2, window_bounds = array<i64: 32, 32>}, {pipeline_mode = #tpu.pipeline_mode<synchronous>, transform_indices = @transform_3, window_bounds = array<i64: 1, 32>}, {pipeline_mode = #tpu.pipeline_mode<synchronous>, transform_indices = @transform_4, window_bounds = array<i64: 1, 32>}, {transform_indices = @transform_5, window_bounds = array<i64: 16, 1, 16, 32>}]} {
    %c0 = arith.constant 0 : index
    %c0_0 = arith.constant 0 : index
    %c0_1 = arith.constant 0 : index
    %0 = vector.load %arg2[%c0, %c0_0, %c0_1] : memref<16x16x32xf32, #tpu.memory_space<vmem>>, vector<16x16x32xf32>
    %1 = vector.shape_cast %0 : vector<16x16x32xf32> to vector<256x32xf32>
    %2 = arith.truncf %1 : vector<256x32xf32> to vector<256x32xbf16>
    %c0_2 = arith.constant 0 : index
    %c0_3 = arith.constant 0 : index
    %c0_4 = arith.constant 0 : index
    %3 = vector.load %arg3[%c0_2, %c0_3, %c0_4] : memref<1x32x32xbf16, #tpu.memory_space<vmem>>, vector<1x32x32xbf16>
    %4 = vector.shape_cast %3 : vector<1x32x32xbf16> to vector<32x32xbf16>
    %cst = arith.constant dense<0.000000e+00> : vector<256x32xf32>
    %5 = tpu.matmul %2, %4, %cst {dimension_numbers = #tpu.dot_dimension_numbers<[1], [0], [0], [1], [0, 0, 1, 1], [], []>} : vector<256x32xbf16>, vector<32x32xbf16>, vector<256x32xf32> -> vector<256x32xf32>
    %c0_5 = arith.constant 0 : index
    %c0_6 = arith.constant 0 : index
    %6 = vector.load %arg4[%c0_5, %c0_6] : memref<32x32xbf16, #tpu.memory_space<vmem>>, vector<32x32xbf16>
    %c0_7 = arith.constant 0 : index
    %c0_8 = arith.constant 0 : index
    %7 = vector.load %arg5[%c0_7, %c0_8] : memref<1x32xf32, #tpu.memory_space<vmem>>, vector<1x32xf32>
    %c0_9 = arith.constant 0 : index
    %c0_10 = arith.constant 0 : index
    %8 = vector.load %arg6[%c0_9, %c0_10] : memref<1x32xf32, #tpu.memory_space<vmem>>, vector<1x32xf32>
    %9 = arith.truncf %5 : vector<256x32xf32> to vector<256x32xbf16>
    %cst_11 = arith.constant dense<0.000000e+00> : vector<256x32xf32>
    %10 = tpu.matmul %9, %6, %cst_11 {dimension_numbers = #tpu.dot_dimension_numbers<[1], [0], [0], [1], [0, 0, 1, 1], [], []>} : vector<256x32xbf16>, vector<32x32xbf16>, vector<256x32xf32> -> vector<256x32xf32>
    %11 = arith.mulf %5, %5 : vector<256x32xf32>
    %12 = arith.truncf %11 : vector<256x32xf32> to vector<256x32xbf16>
    %cst_12 = arith.constant dense<0.000000e+00> : vector<256x32xf32>
    %13 = tpu.matmul %12, %6, %cst_12 {dimension_numbers = #tpu.dot_dimension_numbers<[1], [0], [0], [1], [0, 0, 1, 1], [], []>} : vector<256x32xbf16>, vector<32x32xbf16>, vector<256x32xf32> -> vector<256x32xf32>
    %cst_13 = arith.constant 1.250000e-01 : f32
    %14 = vector.broadcast %cst_13 : f32 to vector<256x32xf32>
    %15 = arith.mulf %10, %14 : vector<256x32xf32>
    %cst_14 = arith.constant 1.250000e-01 : f32
    %16 = vector.broadcast %cst_14 : f32 to vector<256x32xf32>
    %17 = arith.mulf %13, %16 : vector<256x32xf32>
    %18 = arith.mulf %15, %15 : vector<256x32xf32>
    %19 = arith.subf %17, %18 : vector<256x32xf32>
    %cst_15 = arith.constant 0.000000e+00 : f32
    %20 = vector.broadcast %cst_15 : f32 to vector<256x32xf32>
    %21 = arith.maximumf %19, %20 : vector<256x32xf32>
    %22 = arith.subf %5, %15 : vector<256x32xf32>
    %cst_16 = arith.constant 9.99999974E-6 : f32
    %23 = vector.broadcast %cst_16 : f32 to vector<256x32xf32>
    %24 = arith.addf %21, %23 : vector<256x32xf32>
    %25 = math.rsqrt %24 : vector<256x32xf32>
    %26 = arith.mulf %22, %25 : vector<256x32xf32>
    %27 = vector.broadcast %7 : vector<1x32xf32> to vector<256x32xf32>
    %28 = arith.mulf %26, %27 : vector<256x32xf32>
    %29 = vector.broadcast %8 : vector<1x32xf32> to vector<256x32xf32>
    %30 = arith.addf %28, %29 : vector<256x32xf32>
    %31 = vector.shape_cast %30 : vector<256x32xf32> to vector<16x16x32xf32>
    %c0_17 = arith.constant 0 : index
    %c0_18 = arith.constant 0 : index
    %c0_19 = arith.constant 0 : index
    %c0_20 = arith.constant 0 : index
    %32 = vector.load %arg7[%c0_17, %c0_18, %c0_19, %c0_20] : memref<16x1x16x32xf32, #tpu.memory_space<vmem>>, vector<16x1x16x32xf32>
    %33 = vector.shape_cast %32 : vector<16x1x16x32xf32> to vector<16x16x32xf32>
    %34 = vector.shape_cast %31 : vector<16x16x32xf32> to vector<16x1x16x32xf32>
    tpu.vector_store %arg7[%c0_17, %c0_18, %c0_19, %c0_20], %34 {strides = array<i32>} : memref<16x1x16x32xf32, #tpu.memory_space<vmem>>, vector<16x1x16x32xf32>,
    return
  }
  func.func @transform_0(%arg0: i32, %arg1: i32) -> (i32, i32, i32) {
    %c0_i32 = arith.constant 0 : i32
    %c0_i32_0 = arith.constant 0 : i32
    %c0_i32_1 = arith.constant 0 : i32
    return %arg0, %c0_i32, %c0_i32_0 : i32, i32, i32
  }
  func.func @transform_1(%arg0: i32, %arg1: i32) -> (i32, i32, i32) {
    %c0_i32 = arith.constant 0 : i32
    %c0_i32_0 = arith.constant 0 : i32
    %c0_i32_1 = arith.constant 0 : i32
    return %arg1, %c0_i32, %c0_i32_0 : i32, i32, i32
  }
  func.func @transform_2(%arg0: i32, %arg1: i32) -> (i32, i32) {
    %c0_i32 = arith.constant 0 : i32
    %c0_i32_0 = arith.constant 0 : i32
    %c0_i32_1 = arith.constant 0 : i32
    return %c0_i32, %c0_i32_0 : i32, i32
  }
  func.func @transform_3(%arg0: i32, %arg1: i32) -> (i32, i32) {
    %c0_i32 = arith.constant 0 : i32
    %c0_i32_0 = arith.constant 0 : i32
    %c0_i32_1 = arith.constant 0 : i32
    return %c0_i32, %c0_i32_0 : i32, i32
  }
  func.func @transform_4(%arg0: i32, %arg1: i32) -> (i32, i32) {
    %c0_i32 = arith.constant 0 : i32
    %c0_i32_0 = arith.constant 0 : i32
    %c0_i32_1 = arith.constant 0 : i32
    return %c0_i32, %c0_i32_0 : i32, i32
  }
  func.func @transform_5(%arg0: i32, %arg1: i32) -> (i32, i32, i32, i32) {
    %c0_i32 = arith.constant 0 : i32
    %c0_i32_0 = arith.constant 0 : i32
    %c0_i32_1 = arith.constant 0 : i32
    return %arg0, %arg1, %c0_i32, %c0_i32_0 : i32, i32, i32, i32
  }
}

</mosaic_0001>

<bundles_post_ra>
// kernel: tile.13
= control target key start
LH: loop header
LB: loop body
LE: loop exit
PB: predicated region body
PF: predicated region fallthrough
CT: control target
= control target key end

     0   :  { %2 = vsyncpa [#allocation1], 0  ;;  %s44_s6 = smov [#allocation0]   ;;  %s70_s0 = inlined_call_operand.hbm [shape: f32[8], index: 0, kind: input, shape index: {}]   ;;  %s71_s1 = inlined_call_operand.vmem [shape: f32[4,8], index: 1, kind: output, shape index: {}]  }
   0x1   :  { %s9_s7 = sshll.u32 %s44_s6, 4  ;;  %s20_s10 = scalar_lea.hbm %s70_s0, 16  ;;  %s10_s7 = int_to_ptr.vmem [resolvable:$true] %s9_s7 }
   0x2   :  { %p21_p0 = scmp.ne.s32.totalorder %s70_s0, %s20_s10  ;;  %p24_p1 = scmp.lt.u32.totalorder %s20_s10, %s70_s0 }
   0x4   :  { %p26_p2 = pnand %p24_p1, %p21_p0 }
   0x6   :  { %29 = shalt.err (!%p26_p2)
}
   0x7   :  { %s30_s15 = scalar_lea.vmem %s10_s7, 16  ;;  %s34_s16 = scalar_lea.vmem %s10_s7, 32 }
   0x8   :  { %p31_p3 = scmp.ne.s32.totalorder %s10_s7, %s30_s15  ;;  %p35_p4 = scmp.lt.s32.totalorder %s10_s7, %s10_s7 }
   0x9   :  { %p36_p5 = scmp.lt.s32.totalorder %s34_s16, %s30_s15 }
   0xb   :  { %p37_p6 = por %p36_p5, %p35_p4 }
   0xd   :  { %p38_p7 = pnand %p37_p6, %p31_p3 }
   0xf   :  { %41 = shalt.err (!%p38_p7)
}
  0x10   :  { %12 = dma.hbm_to_vmem [thread:$0]  %s70_s0, 16, %s10_s7, [#allocation1]  }
  0x11   :  { %42 = dma.done.wait [#allocation1], 16  }
  0x12   :  { %43 = vsyncadd [#allocation1], 4294967280  ;;  %v16_v0 = vld [vmem:[#allocation0] ss:$0 sm:$0xff] }
  0x13   :  { %17 = vst [vmem:[%s71_s1] sm:$0xf] %v16_v0 }
  0x14   :  { %18 = vsyncpa [#allocation1], 1 }

// kernel: tile.14
= control target key start
LH: loop header
LB: loop body
LE: loop exit
PB: predicated region body
PF: predicated region fallthrough
CT: control target
= control target key end

     0   :  { %vm7_vm0 = vcmask 64512   ;;  %s37_s8 = smov 8   ;;  %s38_s9 = smov 16   ;;  %vm13_vm1 = vcmask 261312   ;;  %vm19_vm2 = vcmask 195712   ;;  %vm25_vm3 = vcmask 130112   ;;  %s55_s0 = inlined_call_operand.vmem [shape: f32[4,8], index: 0, kind: input, shape index: {}]   ;;  %s56_s1 = inlined_call_operand.vmem [shape: f32[1,32], index: 1, kind: output, shape index: {}]  }
   0x1   :  { %v4_v0 = vld [vmem:[%s55_s0] sm:$0xf]  ;;  %s36_s0 = smov 24  }
   0x2   :  { %5 = vst [vmem:[#allocation1] sm:$0xf] %v4_v0 }
   0x9   :  { %v10_v1 = vld [vmem:[#allocation1 + $0x3] sm:$0x1]   ;;  %v22_v2 = vld [vmem:[#allocation1 + $0x1] sm:$0x1]   ;;  %v6_v3 = vld [vmem:[#allocation1] sm:$0x1]  }
   0xa   :  { %11 = vrot.lane.b32.xlu0 %v10_v1, %s36_s0  ;;  %23 = vrot.lane.b32.xlu1 %v22_v2, %s37_s8  ;;  %v16_v4 = vld [vmem:[#allocation1 + $0x2] sm:$0x1]   ;;  %8 = vst.msk [vmem:[#allocation0] sm:$0x1] %vm7_vm0, %v6_v3  }
   0xe   :  { %17 = vrot.lane.b32.xlu0 %v16_v4, %s38_s9 }
  0x7c   :  { %v12_v5 = vpop.permute.xlu0 %11   ;;  %v24_v6 = vpop.permute.xlu1 %23  }
  0x7d   :  { %14 = vst.msk [vmem:[#allocation0] sm:$0x1] %vm13_vm1, %v12_v5  }
  0x80   :  { %v18_v7 = vpop.permute.xlu0 %17  }
  0x81   :  { %20 = vst.msk [vmem:[#allocation0] sm:$0x1] %vm19_vm2, %v18_v7  }
  0x82   :  { %26 = vst.msk [vmem:[#allocation0] sm:$0x1] %vm25_vm3, %v24_v6  }
  0x89   :  { %v30_v8 = vld [vmem:[#allocation0] sm:$0x1] }
  0x8a   :  { %32 = vst [vmem:[%s56_s1] sm:$0x1] %v30_v8 }

// kernel: final_patch_expand2d.1
= control target key start
LH: loop header
LB: loop body
LE: loop exit
PB: predicated region body
PF: predicated region fallthrough
CT: control target
= control target key end

     0   :  { %10 = vsyncpa [#allocation3], 0  ;;  %s3296_s0 = inlined_call_operand.hbm [shape: f32[32,16,32], index: 0, kind: input, shape index: {}]   ;;  %s3297_s1 = inlined_call_operand.vmem [shape: bf16[4,32,32], index: 1, kind: input, shape index: {}]   ;;  %s3298_s2 = inlined_call_operand.vmem [shape: bf16[32,32], index: 2, kind: input, shape index: {}]   ;;  %s3299_s3 = inlined_call_operand.vmem [shape: f32[1,32], index: 3, kind: input, shape index: {}]   ;;  %s3300_s4 = inlined_call_operand.vmem [shape: f32[1,32], index: 4, kind: input, shape index: {}]   ;;  %s3301_s5 = inlined_call_operand.vmem [shape: f32[32,4,16,32], index: 5, kind: output, shape index: {}]  }
   0x1   :  { %12 = vsyncpa [#allocation3 + $0x1], 0  ;;  %s2252_s18 = smov 0   ;;  %s2254_s19 = smov 0  }
   0x2   :  { %s2256_s20 = smov 0   ;;  %s2258_s21 = smov 0  }
   0x3   :  { %s2260_s22 = smov 0   ;;  %s2262_s23 = smov 0  }
   0x4   :  { %s2264_s24 = smov 0   ;;  %s2266_s25 = smov 0  }
   0x5   :  { %s2268_s26 = smov 0   ;;  %s2270_s27 = smov 0  }
   0x6 LB: > { %3311 = sst [smem:[#allocation6_spill]] %s2209_s25  ;;  %s1704_s28 = sadd.s32 4294967295, %s2217_s27   ;;  %s2217_s27 = sphi %s2270_s27, %s18_s27   ;;  %s2213_s26 = sphi %s2268_s26, %s3358_s26   ;;  %s2209_s25 = sphi %s2266_s25, %s3350_s25   ;;  %s2205_s24 = sphi %s2264_s24, %s3357_s24   ;;  %s2201_s23 = sphi %s2262_s23, %s3349_s23   ;;  %s2197_s22 = sphi %s2260_s22, %s3356_s22   ;;  %s2193_s21 = sphi %s2258_s21, %s3355_s21   ;;  %s2189_s20 = sphi %s2256_s20, %s3354_s20   ;;  %s2185_s19 = sphi %s2254_s19, %s3353_s19   ;;  %s2181_s18 = sphi %s2252_s18, %s3352_s18  }
   0x7   : > { %s27_s29 = sadd.s32 1, %s2209_s25  ;;  %s30_s30 = sadd.s32 1, %s2213_s26 }
   0x8   : > { %p28_p0 = scmp.ge.s32.totalorder %s27_s29, 4  ;;  %s37_s6 = sadd.s32 1, %s2197_s22 }
   0x9   : > { %p44_p1 = scmp.ne.s32.totalorder %s2197_s22, %s2193_s21  ;;  %p45_p2 = scmp.eq.s32.totalorder %s2217_s27, 0 }
   0xa   : > { %s3360_s29 = smov (%p28_p0, %s27_s29), 0  ;;  %s3362_s30 = smov (!%p28_p0, %s30_s30), %s2213_s26 }
   0xb   : > { %3312 = sst [smem:[#allocation7_spill]] %s3360_s29  ;;  %p50_p3 = scmp.ne.s32.totalorder %s2193_s21, %s2189_s20 }
   0xc   : > { %p32_p4 = scmp.ge.s32.totalorder %s3362_s30, 2  ;;  %p51_p5 = scmp.eq.s32.totalorder %s1704_s28, 0 }
   0xd   : > { %p2311_p6 = por %p45_p2, %p44_p1  ;;  %s150_s8 = ssub.s32 %s2209_s25, %s3360_s29 }
   0xe   : > { %s3364_s30 = smov (%p32_p4, %s3362_s30), 0  ;;  %p2319_p7 = por %p51_p5, %p50_p3 }
   0xf   : > { %3314 = sst [smem:[#allocation8_spill]] %s3364_s30  ;;  %s154_s10 = sadd.s32 1, %s2185_s19 }
  0x10   : > { %s34_s11 = ssub.s32 %s2213_s26, %s3364_s30  ;;  %p164_p8 = scmp.ne.s32.totalorder %s2185_s19, %s2181_s18 }
  0x11   : > { %p35_p9 = scmp.eq.s32.totalorder %s34_s11, 0  ;;  %s151_s12 = sor.u32 %s150_s8, %s34_s11 }
  0x12   : > { %p152_p10 = scmp.eq.s32.totalorder %s151_s12, 0  ;;  %p165_p11 = scmp.eq.s32.totalorder %s1704_s28, 7 }
  0x13   : > { %s2329_s13 = scalar_select %p35_p9, %s2197_s22, %s37_s6  }
  0x14   : > { %s2332_s14 = scalar_select %p152_p10, %s2185_s19, %s154_s10  }
  0x15   : > { %p2334_p12 = por %p165_p11, %p164_p8  ;;  %p1954_p13 = scmp.lt.s32.totalorder %s2217_s27, 8 }
  0x16   : > { %s200_s16 = sand.u32 1, %s2197_s22   ;;  %s1779_s20 = sshll.u32 %s2213_s26, 12 }
  0x17   : > { %s3316_s15 = scalar_select %p2334_p12, 1, 0 }
  0x18   : > { %s1708_s17 = sshll.u32 %s200_s16, 8  ;;  %s2344_s25 = scalar_lea.hbm %s3296_s0, %s1779_s20 }
  0x19   : > { %s204_s28 = scalar_lea.vmem [#allocation2], %s1708_s17  ;;  %p2350_p0 = pnand %p1954_p13, %p2311_p6 }
  0x1a   : > { %s212_s6 = sshll.u32 %s204_s28, 4  ;;  %s2355_s10 = scalar_lea.sflag [#allocation3], %s200_s16  ;;  %s2346_s6 = int_to_ptr.vmem [resolvable:$true] %s212_s6 }
  0x1b   : > { %s2105_s29 = scalar_lea.hbm %s2344_s25, 4096  ;;  %p2107_p3 = pneg %p2350_p0 }
  0x1c   : > { %p2106_p2 = scmp.ne.s32.totalorder %s2344_s25, %s2105_s29  ;;  %s2110_s7 = scalar_lea.hbm %s3296_s0, 8192 }
  0x1d   : > { %p2111_p6 = scmp.lt.u32.totalorder %s2344_s25, %s3296_s0  ;;  %p2112_p8 = scmp.lt.u32.totalorder %s2110_s7, %s2105_s29 }
  0x1e   : > { %p2108_p4 = pnand %p2107_p3, %p2106_p2  ;;  %p2114_p10 = scmp.lt.u32.totalorder %s2105_s29, %s2344_s25 }
  0x1f   : > { %p2113_p9 = por %p2112_p8, %p2111_p6 }
  0x20   : > { %p2109_p5 = pneg %p2108_p4 }
  0x21   : > { %p2115_p11 = por %p2114_p10, %p2113_p9 }
  0x23   : > { %p2116_p13 = pnand %p2115_p11, %p2109_p5 }
  0x25   : > { %2119 = shalt.err (!%p2116_p13)
}
  0x26   : > { %s2120_s16 = scalar_lea.vmem %s2346_s6, 4096  ;;  %s2219_s20 = smov [#allocation2]  }
  0x27   : > { %p2121_p2 = scmp.ne.s32.totalorder %s2346_s6, %s2120_s16  ;;  %s2125_s28 = sshll.u32 %s2219_s20, 4  ;;  %s2126_s28 = int_to_ptr.vmem [resolvable:$false] %s2125_s28 }
  0x28   : > { %s2127_s30 = scalar_lea.vmem %s2126_s28, 8192  ;;  %p2128_p12 = scmp.lt.s32.totalorder %s2346_s6, %s2126_s28 }
  0x29   : > { %p2123_p4 = pnand %p2121_p2, %p2107_p3  ;;  %p2129_p6 = scmp.lt.s32.totalorder %s2127_s30, %s2120_s16 }
  0x2b   : > { %p2124_p1 = pneg %p2123_p4  ;;  %p2130_p8 = por %p2129_p6, %p2128_p12 }
  0x2d   : > { %p2131_p9 = pnand %p2130_p8, %p2124_p1 }
  0x2f   : > { %2134 = shalt.err (!%p2131_p9)
}
  0x30   : > { %s2220_s29 = smov 128   ;;  %s2221_s11 = smov 8  }
  0x31   : > { %1953 = dma.hbm_to_vmem [thread:$0]  (!%p2350_p0), %s2344_s25, 4096, %s2346_s6, %s2355_s10, %s2220_s29, %s2220_s29, %s2221_s11  }
  0x32   : > { %p228_p3 = scmp.lt.s32.totalorder %s2217_s27, 9  ;;  %p3318_p5 = scmp.ge.s32.totalorder %s2217_s27, 1 }
  0x34   : > { %p229_p10 = pnand %p3318_p5, %p228_p3 }
  0x36   : > { %232 = sbr.rel (%p229_p10) target bundleno = 627 (0x273), region = 40 }
  0x3d   : > { %s234_s7 = sand.u32 1, %s2193_s21  }
  0x3e   : > { %s1713_s12 = sshll.u32 %s234_s7, 8  ;;  %s235_s17 = scalar_lea.sflag [#allocation3], %s234_s7 }
  0x3f   : > { %s2387_s16 = scalar_lea.vmem [#allocation2], %s1713_s12 }
  0x40   : > { %2176 = dma.done.wait (%p2319_p7), %s235_s17, 4096  }
  0x41   : > { %2178 = vsyncadd (%p2319_p7), %s235_s17, 4294963200  ;;  %p270_p12 = scmp.lt.s32.totalorder %s2201_s23, 3  ;;  %v277_v2 = vld [vmem:[%s2387_s16] sm:$0xff]  ;;  %v278_v3 = vld [vmem:[%s2387_s16 + $0x8] sm:$0xff]  ;;  %vm341_vm0 = vcmask 261120   ;;  %s266_s11 = sand.u32 1, %s2181_s18  }
  0x42   : > { %v309_v4 = vpack.c.bf16 %v278_v3, %v277_v2  ;;  %v279_v5 = vld [vmem:[%s2387_s16 + $0x10] sm:$0xff]  ;;  %v280_v6 = vld [vmem:[%s2387_s16 + $0x18] sm:$0xff]  ;;  %v281_v7 = vld [vmem:[%s2387_s16 + $0x20] sm:$0xff]  ;;  %s2763_s18 = sshll.u32 %s266_s11, 8  ;;  %p3348_p7 = scmp.ne.s32.totalorder %s3316_s15, 0 }
  0x43   : > { %s271_s25 = scalar_select %p270_p12, %s2201_s23, 3  ;;  %v282_v8 = vld [vmem:[%s2387_s16 + $0x28] sm:$0xff]  ;;  %v310_v9 = vpack.c.bf16 %v280_v6, %v279_v5  ;;  %v293_v11 = vld [vmem:[%s2387_s16 + $0x80] sm:$0xff]  ;;  %v295_v14 = vld [vmem:[%s2387_s16 + $0x90] sm:$0xff] }
  0x44   : > { %1840 = vmatprep.mubr.msk.bf16.mxu0 %vm341_vm0, %v309_v4  ;;  %v311_v10 = vpack.c.bf16 %v282_v8, %v281_v7  ;;  %v294_v12 = vld [vmem:[%s2387_s16 + $0x88] sm:$0xff]  ;;  %v296_v15 = vld [vmem:[%s2387_s16 + $0x98] sm:$0xff]  ;;  %v297_v16 = vld [vmem:[%s2387_s16 + $0xa0] sm:$0xff]  ;;  %s1781_s8 = sshll.u32 (%p3348_p7), %s2205_s24, 7 }
  0x45   : > { %s1780_s6 = sshll.u32 %s271_s25, 4  ;;  %v317_v13 = vpack.c.bf16 %v294_v12, %v293_v11  ;;  %v318_v17 = vpack.c.bf16 %v296_v15, %v295_v14  ;;  %v298_v18 = vld [vmem:[%s2387_s16 + $0xa8] sm:$0xff]  ;;  %v283_v19 = vld [vmem:[%s2387_s16 + $0x30] sm:$0xff]  ;;  %v284_v20 = vld [vmem:[%s2387_s16 + $0x38] sm:$0xff]  ;;  %s2799_s25 = scalar_lea.vmem [#allocation4], %s2763_s18 }
  0x46   : > { %s274_s20 = scalar_lea.vmem %s3297_s1, %s1780_s6  ;;  %v285_v21 = vld [vmem:[%s2387_s16 + $0x40] sm:$0xff]  ;;  %v319_v22 = vpack.c.bf16 %v298_v18, %v297_v16  ;;  %v286_v23 = vld [vmem:[%s2387_s16 + $0x48] sm:$0xff]  ;;  %v299_v24 = vld [vmem:[%s2387_s16 + $0xb0] sm:$0xff]  ;;  %v312_v29 = vpack.c.bf16 %v284_v20, %v283_v19  ;;  %s1773_s6 = sshll.u32 (%p3348_p7), %s2201_s23, 1 }
  0x47   : > { %v2037_v0 = vld [vmem:[%s274_s20] sm:$0xff]   ;;  %v2038_v1 = vld [vmem:[%s274_s20 + $0x8] sm:$0xff]   ;;  %1856 = vmatprep.mubr.msk.bf16.mxu1 %vm341_vm0, %v317_v13  ;;  %v300_v25 = vld [vmem:[%s2387_s16 + $0xb8] sm:$0xff]  ;;  %v313_v31 = vpack.c.bf16 %v286_v23, %v285_v21  ;;  %s1457_s15 = sadd.s32 (%p3348_p7), %s1781_s8, %s1773_s6 }
  0x48   : > { %1836 = vmatprep.subr.bf16.mxu0 %v2037_v0  ;;  %1944 = vmatprep.subr.bf16.mxu1 %v2037_v0  ;;  %v301_v26 = vld [vmem:[%s2387_s16 + $0xc0] sm:$0xff]  ;;  %v302_v27 = vld [vmem:[%s2387_s16 + $0xc8] sm:$0xff]  ;;  %v320_v32 = vpack.c.bf16 %v300_v25, %v299_v24  ;;  %v287_v34 = vld [vmem:[%s2387_s16 + $0x50] sm:$0xff]  ;;  %s1775_s10 = sshll.u32 (%p3348_p7), %s1457_s15, 3 }
  0x49   : > { %1837 = vmatpush3.bf16.msra.mxu0 %v2037_v0  ;;  %1946 = vmatpush3.bf16.msra.mxu1 %v2037_v0  ;;  %v2039_v28 = vld [vmem:[%s3298_s2] sm:$0xff]   ;;  %v2040_v30 = vld [vmem:[%s3298_s2 + $0x8] sm:$0xff]   ;;  %v321_v33 = vpack.c.bf16 %v302_v27, %v301_v26  ;;  %v288_v35 = vld [vmem:[%s2387_s16 + $0x58] sm:$0xff]  ;;  %s3209_s28 = scalar_lea.vmem (%p3348_p7), %s3301_s5, %s1775_s10 }
  0x4a   : > { %1838 = vmatprep.subr.bf16.mxu0 %v2038_v1  ;;  %1945 = vmatprep.subr.bf16.mxu1 %v2038_v1  ;;  %v289_v36 = vld [vmem:[%s2387_s16 + $0x60] sm:$0xff]  ;;  %v290_v37 = vld [vmem:[%s2387_s16 + $0x68] sm:$0xff]  ;;  %v303_v38 = vld [vmem:[%s2387_s16 + $0xd0] sm:$0xff]  ;;  %v314_v42 = vpack.c.bf16 %v288_v35, %v287_v34 }
  0x4b   : > { %v304_v39 = vld [vmem:[%s2387_s16 + $0xd8] sm:$0xff]  ;;  %v305_v40 = vld [vmem:[%s2387_s16 + $0xe0] sm:$0xff]  ;;  %v306_v41 = vld [vmem:[%s2387_s16 + $0xe8] sm:$0xff]  ;;  %v315_v43 = vpack.c.bf16 %v290_v37, %v289_v36 }
  0x4c   : > { %v322_v44 = vpack.c.bf16 %v304_v39, %v303_v38  ;;  %v323_v45 = vpack.c.bf16 %v306_v41, %v305_v40  ;;  %v291_v46 = vld [vmem:[%s2387_s16 + $0x70] sm:$0xff]  ;;  %v292_v47 = vld [vmem:[%s2387_s16 + $0x78] sm:$0xff] }
  0x4d   : > { %1839 = vmatpush3.bf16.msra.mxu0 %v2038_v1  ;;  %1947 = vmatpush3.bf16.msra.mxu1 %v2038_v1  ;;  %v307_v48 = vld [vmem:[%s2387_s16 + $0xf0] sm:$0xff]  ;;  %v308_v49 = vld [vmem:[%s2387_s16 + $0xf8] sm:$0xff]  ;;  %v316_v50 = vpack.c.bf16 %v292_v47, %v291_v46 }
  0x4e   : > { %1872 = vmatprep.subr.bf16.mxu1 %v2039_v28  ;;  %1908 = vmatprep.subr.bf16.mxu0 %v2039_v28  ;;  %v324_v51 = vpack.c.bf16 %v308_v49, %v307_v48 }
  0x50   : > { %1841 = vmatmul.mubr.msk.bf16.vlgmr.msra.gmra.mrb[0].mxu0 %vm341_vm0, %v310_v9  ;;  %1857 = vmatmul.mubr.msk.bf16.vlgmr.msra.gmra.mrb[0].mxu1 %vm341_vm0, %v318_v17 }
  0x51   : > { %1844 = vmatprep.mubr.msk.bf16.mxu0 %vm341_vm0, %v311_v10  ;;  %1860 = vmatprep.mubr.msk.bf16.mxu1 %vm341_vm0, %v319_v22 }
  0x52   : > { %1873 = vmatpush3.bf16.msra.mxu1 %v2039_v28  ;;  %1909 = vmatpush3.bf16.msra.mxu0 %v2039_v28 }
  0x53   : > { %1874 = vmatprep.subr.bf16.mxu1 %v2040_v30  ;;  %1910 = vmatprep.subr.bf16.mxu0 %v2040_v30 }
  0x56   : > { %1875 = vmatpush3.bf16.msra.mxu1 %v2040_v30  ;;  %1911 = vmatpush3.bf16.msra.mxu0 %v2040_v30 }
  0x58   : > { %1845 = vmatmul.mubr.msk.bf16.gmra.mrb[4].mxu0 %vm341_vm0, %v312_v29  ;;  %1861 = vmatmul.mubr.msk.bf16.gmra.mrb[4].mxu1 %vm341_vm0, %v320_v32 }
  0x59   : > { %1848 = vmatprep.mubr.msk.bf16.mxu0 %vm341_vm0, %v313_v31  ;;  %1864 = vmatprep.mubr.msk.bf16.mxu1 %vm341_vm0, %v321_v33 }
  0x60   : > { %1849 = vmatmul.mubr.msk.bf16.gmra.mrb[8].mxu0 %vm341_vm0, %v314_v42  ;;  %1865 = vmatmul.mubr.msk.bf16.gmra.mrb[8].mxu1 %vm341_vm0, %v322_v44 }
  0x61   : > { %1852 = vmatprep.mubr.msk.bf16.mxu0 %vm341_vm0, %v315_v43  ;;  %1868 = vmatprep.mubr.msk.bf16.mxu1 %vm341_vm0, %v323_v45 }
  0x68   : > { %1853 = vmatmul.mubr.msk.bf16.gmra.mrb[12].mxu0 %vm341_vm0, %v316_v50  ;;  %1869 = vmatmul.mubr.msk.bf16.gmra.mrb[12].mxu1 %vm341_vm0, %v324_v51 }
 0x123   : > { %v2452_v52 = vpop.f32.mrb[0].mxu0  ;;  %v2456_v54 = vpop.f32.mrb[0].mxu1 }
 0x124   : > { %v2454_v53 = vpop.f32.mrb[1].mxu0  ;;  %v796_v55 = vmul.f32 %v2452_v52, %v2452_v52  ;;  %v2464_v57 = vmul.f32 %v2456_v54, %v2456_v54  ;;  %v2466_v58 = vpop.f32.mrb[1].mxu1 }
 0x125   : > { %v2460_v56 = vpop.f32.mrb[2].mxu0  ;;  %v794_v59 = vmul.f32 %v2454_v53, %v2454_v53  ;;  %v2478_v63 = vmul.f32 %v2466_v58, %v2466_v58  ;;  %v2480_v0 = vpop.f32.mrb[2].mxu1 }
 0x126   : > { %v558_v60 = vpack.c.bf16 %v2460_v56, %v2452_v52  ;;  %v797_v61 = vmul.f32 %v2460_v56, %v2460_v56  ;;  %v2474_v62 = vpop.f32.mrb[3].mxu0  ;;  %v566_v3 = vpack.c.bf16 %v2480_v0, %v2456_v54  ;;  %v2490_v4 = vmul.f32 %v2480_v0, %v2480_v0  ;;  %v2492_v5 = vpop.f32.mrb[3].mxu1 }
 0x127   : > { %v557_v1 = vpack.c.bf16 %v2474_v62, %v2454_v53  ;;  %v795_v2 = vmul.f32 %v2474_v62, %v2474_v62  ;;  %v565_v7 = vpack.c.bf16 %v2492_v5, %v2466_v58  ;;  %v2498_v8 = vmul.f32 %v2492_v5, %v2492_v5 }
 0x128   : > { %v827_v6 = vpack.c.bf16 %v797_v61, %v796_v55 }
 0x129   : > { %v826_v9 = vpack.c.bf16 %v795_v2, %v794_v59  ;;  %1876 = vmatprep.mubr.msk.bf16.mxu1 %vm341_vm0, %v557_v1  ;;  %v834_v11 = vpack.c.bf16 %v2498_v8, %v2478_v63 }
 0x12a   : > { %1877 = vmatmul.mubr.msk.bf16.vlgmr.msra.gmra.mrb[16].mxu1 %vm341_vm0, %v558_v60 }
 0x12b   : > { %v2506_v12 = vpop.f32.mrb[4].mxu0  ;;  %1912 = vmatprep.mubr.msk.bf16.mxu0 %vm341_vm0, %v826_v9  ;;  %v2512_v14 = vpop.f32.mrb[4].mxu1 }
 0x12c   : > { %v2509_v13 = vpop.f32.mrb[5].mxu0  ;;  %1913 = vmatmul.mubr.msk.bf16.vlgmr.msra.gmra.mrb[16].mxu0 %vm341_vm0, %v827_v6  ;;  %v800_v15 = vmul.f32 %v2506_v12, %v2506_v12  ;;  %v2520_v17 = vmul.f32 %v2512_v14, %v2512_v14  ;;  %v2522_v18 = vpop.f32.mrb[5].mxu1 }
 0x12d   : > { %v2516_v16 = vpop.f32.mrb[6].mxu0  ;;  %v798_v19 = vmul.f32 %v2509_v13, %v2509_v13  ;;  %v2534_v23 = vmul.f32 %v2522_v18, %v2522_v18  ;;  %v2536_v24 = vpop.f32.mrb[6].mxu1 }
 0x12e   : > { %v560_v20 = vpack.c.bf16 %v2516_v16, %v2506_v12  ;;  %v801_v21 = vmul.f32 %v2516_v16, %v2516_v16  ;;  %v2530_v22 = vpop.f32.mrb[7].mxu0  ;;  %v2546_v28 = vmul.f32 %v2536_v24, %v2536_v24  ;;  %v2548_v29 = vpop.f32.mrb[7].mxu1  ;;  %v3325_v8 = vpack.c.bf16 %v2536_v24, %v2512_v14 }
 0x12f   : > { %v559_v25 = vpack.c.bf16 %v2530_v22, %v2509_v13  ;;  %v799_v26 = vmul.f32 %v2530_v22, %v2530_v22  ;;  %v567_v31 = vpack.c.bf16 %v2548_v29, %v2522_v18  ;;  %v2554_v32 = vmul.f32 %v2548_v29, %v2548_v29 }
 0x130   : > { %v829_v30 = vpack.c.bf16 %v801_v21, %v800_v15 }
 0x131   : > { %v828_v33 = vpack.c.bf16 %v799_v26, %v798_v19  ;;  %1880 = vmatprep.mubr.msk.bf16.mxu1 %vm341_vm0, %v559_v25  ;;  %v3324_v63 = vpack.c.bf16 %v2554_v32, %v2534_v23 }
 0x132   : > { %1881 = vmatmul.mubr.msk.bf16.gmra.mrb[20].mxu1 %vm341_vm0, %v560_v20 }
 0x133   : > { %v2562_v36 = vpop.f32.mrb[8].mxu0  ;;  %1916 = vmatprep.mubr.msk.bf16.mxu0 %vm341_vm0, %v828_v33  ;;  %v2568_v38 = vpop.f32.mrb[8].mxu1 }
 0x134   : > { %v2565_v37 = vpop.f32.mrb[9].mxu0  ;;  %1917 = vmatmul.mubr.msk.bf16.gmra.mrb[20].mxu0 %vm341_vm0, %v829_v30  ;;  %v804_v39 = vmul.f32 %v2562_v36, %v2562_v36  ;;  %v2576_v41 = vmul.f32 %v2568_v38, %v2568_v38  ;;  %v2578_v42 = vpop.f32.mrb[9].mxu1 }
 0x135   : > { %v2572_v40 = vpop.f32.mrb[10].mxu0  ;;  %v802_v43 = vmul.f32 %v2565_v37, %v2565_v37  ;;  %v818_v47 = vmul.f32 %v2578_v42, %v2578_v42  ;;  %v2590_v48 = vpop.f32.mrb[10].mxu1 }
 0x136   : > { %v562_v44 = vpack.c.bf16 %v2572_v40, %v2562_v36  ;;  %v805_v45 = vmul.f32 %v2572_v40, %v2572_v40  ;;  %v2586_v46 = vpop.f32.mrb[11].mxu0  ;;  %v570_v51 = vpack.c.bf16 %v2590_v48, %v2568_v38  ;;  %v821_v55 = vmul.f32 %v2590_v48, %v2590_v48  ;;  %v2600_v59 = vpop.f32.mrb[11].mxu1 }
 0x137   : > { %v561_v49 = vpack.c.bf16 %v2586_v46, %v2565_v37  ;;  %v803_v50 = vmul.f32 %v2586_v46, %v2586_v46  ;;  %v569_v61 = vpack.c.bf16 %v2600_v59, %v2578_v42  ;;  %v819_v1 = vmul.f32 %v2600_v59, %v2600_v59 }
 0x138   : > { %v831_v60 = vpack.c.bf16 %v805_v45, %v804_v39  ;;  %v839_v6 = vpack.c.bf16 %v821_v55, %v2576_v41 }
 0x139   : > { %v830_v2 = vpack.c.bf16 %v803_v50, %v802_v43  ;;  %1884 = vmatprep.mubr.msk.bf16.mxu1 %vm341_vm0, %v561_v49  ;;  %v838_v9 = vpack.c.bf16 %v819_v1, %v818_v47 }
 0x13a   : > { %1885 = vmatmul.mubr.msk.bf16.gmra.mrb[24].mxu1 %vm341_vm0, %v562_v44 }
 0x13b   : > { %v2609_v15 = vpop.f32.mrb[12].mxu0  ;;  %1920 = vmatprep.mubr.msk.bf16.mxu0 %vm341_vm0, %v830_v2  ;;  %v2615_v20 = vpop.f32.mrb[12].mxu1 }
 0x13c   : > { %v2612_v19 = vpop.f32.mrb[13].mxu0  ;;  %1921 = vmatmul.mubr.msk.bf16.gmra.mrb[24].mxu0 %vm341_vm0, %v831_v60  ;;  %3319 = vst [vmem:[#allocation9_spill] sm:$0xff] %v2615_v20  ;;  %v808_v21 = vmul.f32 %v2609_v15, %v2609_v15  ;;  %v824_v26 = vmul.f32 %v2615_v20, %v2615_v20  ;;  %v2623_v30 = vpop.f32.mrb[13].mxu1 }
 0x13d   : > { %v2619_v25 = vpop.f32.mrb[14].mxu0  ;;  %3320 = vst [vmem:[#allocation10_spill] sm:$0xff] %v2623_v30  ;;  %v806_v33 = vmul.f32 %v2612_v19, %v2612_v19  ;;  %v822_v44 = vmul.f32 %v2623_v30, %v2623_v30  ;;  %v2635_v45 = vpop.f32.mrb[14].mxu1 }
 0x13e   : > { %v564_v39 = vpack.c.bf16 %v2619_v25, %v2609_v15  ;;  %v809_v41 = vmul.f32 %v2619_v25, %v2619_v25  ;;  %v2631_v43 = vpop.f32.mrb[15].mxu0  ;;  %3321 = vst [vmem:[#allocation11_spill] sm:$0xff] %v2635_v45  ;;  %v572_v50 = vpack.c.bf16 %v2635_v45, %v2615_v20  ;;  %v825_v55 = vmul.f32 %v2635_v45, %v2635_v45  ;;  %v2645_v60 = vpop.f32.mrb[15].mxu1 }
 0x13f   : > { %v563_v47 = vpack.c.bf16 %v2631_v43, %v2612_v19  ;;  %v807_v49 = vmul.f32 %v2631_v43, %v2631_v43  ;;  %3322 = vst [vmem:[#allocation12_spill] sm:$0xff] %v2645_v60  ;;  %v571_v2 = vpack.c.bf16 %v2645_v60, %v2623_v30  ;;  %v823_v34 = vmul.f32 %v2645_v60, %v2645_v60 }
 0x140   : > { %v833_v1 = vpack.c.bf16 %v809_v41, %v808_v21  ;;  %v841_v35 = vpack.c.bf16 %v825_v55, %v824_v26 }
 0x141   : > { %v832_v27 = vpack.c.bf16 %v807_v49, %v806_v33  ;;  %1888 = vmatprep.mubr.msk.bf16.mxu1 %vm341_vm0, %v563_v47  ;;  %v840_v10 = vpack.c.bf16 %v823_v34, %v822_v44 }
 0x142   : > { %1889 = vmatmul.mubr.msk.bf16.gmra.mrb[28].mxu1 %vm341_vm0, %v564_v39 }
 0x143   : > { %1924 = vmatprep.mubr.msk.bf16.mxu0 %vm341_vm0, %v832_v27  ;;  %1892 = vmatprep.mubr.msk.bf16.mxu1 %vm341_vm0, %v565_v7  ;;  %v3323_v7 = vpack.c.bf16 %v2490_v4, %v2464_v57 }
 0x144   : > { %1925 = vmatmul.mubr.msk.bf16.gmra.mrb[28].mxu0 %vm341_vm0, %v833_v1 }
 0x145   : > { %1928 = vmatprep.mubr.msk.bf16.mxu0 %vm341_vm0, %v834_v11 }
 0x14a   : > { %1893 = vmatmul.mubr.msk.bf16.gmra.mrb[32].mxu1 %vm341_vm0, %v566_v3  ;;  %v3326_v3 = vpack.c.bf16 %v2546_v28, %v2520_v17 }
 0x14b   : > { %1896 = vmatprep.mubr.msk.bf16.mxu1 %vm341_vm0, %v567_v31 }
 0x14c   : > { %1929 = vmatmul.mubr.msk.bf16.gmra.mrb[32].mxu0 %vm341_vm0, %v3323_v7 }
 0x14d   : > { %1932 = vmatprep.mubr.msk.bf16.mxu0 %vm341_vm0, %v3324_v63 }
 0x152   : > { %1897 = vmatmul.mubr.msk.bf16.gmra.mrb[36].mxu1 %vm341_vm0, %v3325_v8 }
 0x153   : > { %1900 = vmatprep.mubr.msk.bf16.mxu1 %vm341_vm0, %v569_v61 }
 0x154   : > { %1933 = vmatmul.mubr.msk.bf16.gmra.mrb[36].mxu0 %vm341_vm0, %v3326_v3 }
 0x155   : > { %1936 = vmatprep.mubr.msk.bf16.mxu0 %vm341_vm0, %v838_v9 }
 0x15a   : > { %1901 = vmatmul.mubr.msk.bf16.gmra.mrb[40].mxu1 %vm341_vm0, %v570_v51 }
 0x15b   : > { %1904 = vmatprep.mubr.msk.bf16.mxu1 %vm341_vm0, %v571_v2 }
 0x15c   : > { %1937 = vmatmul.mubr.msk.bf16.gmra.mrb[40].mxu0 %vm341_vm0, %v839_v6 }
 0x15d   : > { %1940 = vmatprep.mubr.msk.bf16.mxu0 %vm341_vm0, %v840_v10 }
 0x162   : > { %1905 = vmatmul.mubr.msk.bf16.gmra.mrb[44].mxu1 %vm341_vm0, %v572_v50 }
 0x164   : > { %1941 = vmatmul.mubr.msk.bf16.gmra.mrb[44].mxu0 %vm341_vm0, %v841_v35 }
 0x1fd   : > { %v1878_v57 = vpop.f32.mrb[16].mxu1 }
 0x1fe   : > { %v2695_v4 = vmul.f32 0.125, %v1878_v57  ;;  %v667_v11 = vpop.f32.mrb[17].mxu1 }
 0x1ff   : > { %v2697_v17 = vmul.f32 0.125, %v667_v11  ;;  %v1879_v23 = vpop.f32.mrb[18].mxu1  ;;  %v1914_v27 = vpop.f32.mrb[16].mxu0 }
 0x200   : > { %v1117_v28 = vmul.f32 %v2695_v4, %v2695_v4  ;;  %v1213_v31 = vsub.f32 %v2452_v52, %v2695_v4  ;;  %v2703_v32 = vmul.f32 0.125, %v1879_v23  ;;  %v1085_v10 = vmul.f32 0.125, %v1914_v27  ;;  %v670_v34 = vpop.f32.mrb[19].mxu1  ;;  %v924_v51 = vpop.f32.mrb[17].mxu0 }
 0x201   : > { %v1115_v35 = vmul.f32 %v2697_v17, %v2697_v17  ;;  %v2709_v6 = vmul.f32 0.125, %v670_v34  ;;  %v1083_v9 = vmul.f32 0.125, %v924_v51  ;;  %v1915_v21 = vpop.f32.mrb[18].mxu0 }
 0x202   : > { %v1118_v26 = vmul.f32 %v2703_v32, %v2703_v32  ;;  %v1149_v39 = vsub.f32 %v1085_v10, %v1117_v28  ;;  %v1086_v41 = vmul.f32 0.125, %v1915_v21  ;;  %v927_v44 = vpop.f32.mrb[19].mxu0 }
 0x203   : > { %v1116_v47 = vmul.f32 %v2709_v6, %v2709_v6  ;;  %v1147_v50 = vsub.f32 %v1083_v9, %v1115_v35  ;;  %v1084_v55 = vmul.f32 0.125, %v927_v44 }
 0x204   : > { %v1181_v1 = vmax.f32 %v1149_v39, 0.0  ;;  %v1150_v2 = vsub.f32 %v1086_v41, %v1118_v26 }
 0x205   : > { %v1179_v7 = vmax.f32 %v1147_v50, 0.0  ;;  %v1148_v63 = vsub.f32 %v1084_v55, %v1116_v47  ;;  %v1882_v8 = vpop.f32.mrb[20].mxu1 }
 0x206   : > { %v1245_v3 = vadd.f32 1e-05, %v1181_v1  ;;  %v1182_v57 = vmax.f32 %v1150_v2, 0.0  ;;  %v2719_v11 = vmul.f32 0.125, %v1882_v8  ;;  %v683_v23 = vpop.f32.mrb[21].mxu1 }
 0x207   : > { %v1243_v27 = vadd.f32 1e-05, %v1179_v7  ;;  %v1180_v28 = vmax.f32 %v1148_v63, 0.0  ;;  %v2721_v10 = vmul.f32 0.125, %v683_v23  ;;  %v1883_v34 = vpop.f32.mrb[22].mxu1  ;;  %v1918_v51 = vpop.f32.mrb[20].mxu0 }
 0x208   : > { %2041 = vrsqrt.f32 %v1245_v3  ;;  %v1246_v21 = vadd.f32 1e-05, %v1182_v57  ;;  %v1121_v35 = vmul.f32 %v2719_v11, %v2719_v11  ;;  %v686_v26 = vpop.f32.mrb[23].mxu1  ;;  %v940_v39 = vpop.f32.mrb[21].mxu0  ;;  %v2731_v55 = vmul.f32 0.125, %v1883_v34 }
 0x209   : > { %2043 = vrsqrt.f32 %v1243_v27  ;;  %v1244_v41 = vadd.f32 1e-05, %v1180_v28  ;;  %v1119_v44 = vmul.f32 %v2721_v10, %v2721_v10  ;;  %v1919_v50 = vpop.f32.mrb[22].mxu0  ;;  %v1089_v1 = vmul.f32 0.125, %v1918_v51 }
 0x20a   : > { %2045 = vrsqrt.f32 %v1246_v21  ;;  %v2733_v2 = vmul.f32 0.125, %v686_v26  ;;  %v943_v7 = vpop.f32.mrb[23].mxu0  ;;  %v1087_v63 = vmul.f32 0.125, %v940_v39  ;;  %v1090_v8 = vmul.f32 0.125, %v1919_v50 }
 0x20b   : > { %2047 = vrsqrt.f32 %v1244_v41  ;;  %v1088_v3 = vmul.f32 0.125, %v943_v7  ;;  %v1122_v57 = vmul.f32 %v2731_v55, %v2731_v55  ;;  %v1153_v27 = vsub.f32 %v1089_v1, %v1121_v35 }
 0x20c   : > { %v1120_v28 = vmul.f32 %v2733_v2, %v2733_v2  ;;  %v1151_v51 = vsub.f32 %v1087_v63, %v1119_v44 }
 0x20d   : > { %v1886_v21 = vpop.f32.mrb[24].mxu1  ;;  %v1185_v26 = vmax.f32 %v1153_v27, 0.0  ;;  %v1154_v41 = vsub.f32 %v1090_v8, %v1122_v57  ;;  %v2753_v8 = vld [vmem:[%s3299_s3] ss:$0 sm:$0xff] }
 0x20e   : > { %v1152_v39 = vsub.f32 %v1088_v3, %v1120_v28  ;;  %v2743_v50 = vmul.f32 0.125, %v1886_v21  ;;  %v699_v7 = vpop.f32.mrb[25].mxu1  ;;  %v1183_v47 = vmax.f32 %v1151_v51, 0.0 }
 0x20f   : > { %v2746_v9 = vmul.f32 0.125, %v699_v7  ;;  %v1887_v23 = vpop.f32.mrb[26].mxu1  ;;  %v1922_v35 = vpop.f32.mrb[24].mxu0  ;;  %v1249_v1 = vadd.f32 1e-05, %v1185_v26  ;;  %v1186_v49 = vmax.f32 %v1154_v41, 0.0 }
 0x210   : > { %v1184_v33 = vmax.f32 %v1152_v39, 0.0  ;;  %v1125_v34 = vmul.f32 %v2743_v50, %v2743_v50  ;;  %v702_v44 = vpop.f32.mrb[27].mxu1  ;;  %v956_v63 = vpop.f32.mrb[25].mxu0  ;;  %v1247_v3 = vadd.f32 1e-05, %v1183_v47  ;;  %v2761_v39 = vmul.f32 0.125, %v1887_v23 }
 0x211   : > { %v1123_v27 = vmul.f32 %v2746_v9, %v2746_v9  ;;  %v1923_v51 = vpop.f32.mrb[26].mxu0  ;;  %2049 = vrsqrt.f32 %v1249_v1  ;;  %v1250_v26 = vadd.f32 1e-05, %v1186_v49  ;;  %v1093_v57 = vmul.f32 0.125, %v1922_v35  ;;  %v2773_v49 = vld [vmem:[%s3300_s4] ss:$0 sm:$0xff] }
 0x212   : > { %v2042_v21 = vpop.eup %2041  ;;  %v1248_v41 = vadd.f32 1e-05, %v1184_v33  ;;  %v959_v7 = vpop.f32.mrb[27].mxu0  ;;  %2051 = vrsqrt.f32 %v1247_v3  ;;  %v2768_v60 = vmul.f32 0.125, %v702_v44  ;;  %v3327_v33 = vsub.f32 %v2454_v53, %v2697_v17 }
 0x213   : > { %v2044_v61 = vpop.eup %2043  ;;  %v1309_v47 = vmul.f32 %v2042_v21, %v1213_v31  ;;  %2053 = vrsqrt.f32 %v1250_v26  ;;  %v1126_v1 = vmul.f32 %v2761_v39, %v2761_v39  ;;  %v3328_v35 = vsub.f32 %v2460_v56, %v2703_v32 }
 0x214   : > { %v2046_v28 = vpop.eup %2045  ;;  %v1307_v23 = vmul.f32 %v2044_v61, %v3327_v33  ;;  %2055 = vrsqrt.f32 %v1248_v41  ;;  %v1157_v3 = vsub.f32 %v1093_v57, %v1125_v34  ;;  %v3329_v17 = vsub.f32 %v2474_v62, %v2709_v6 }
 0x215   : > { %v2048_v4 = vpop.eup %2047  ;;  %v1347_v31 = vmul.f32 %v2753_v8, %v1309_v47  ;;  %v1310_v44 = vmul.f32 %v2046_v28, %v3328_v35  ;;  %v1890_v21 = vpop.f32.mrb[28].mxu1  ;;  %v1124_v26 = vmul.f32 %v2768_v60, %v2768_v60  ;;  %v1091_v57 = vmul.f32 0.125, %v956_v63 }
 0x216   : > { %v1345_v53 = vmul.f32 %v2753_v8, %v1307_v23  ;;  %v1308_v61 = vmul.f32 %v2048_v4, %v3329_v17  ;;  %v715_v33 = vpop.f32.mrb[29].mxu1  ;;  %v1189_v34 = vmax.f32 %v1157_v3, 0.0  ;;  %v1094_v6 = vmul.f32 0.125, %v1923_v51 }
 0x217   : > { %v1385_v56 = vadd.f32 %v2773_v49, %v1347_v31  ;;  %v1348_v32 = vmul.f32 %v2753_v8, %v1310_v44  ;;  %v1891_v28 = vpop.f32.mrb[30].mxu1  ;;  %v1926_v41 = vpop.f32.mrb[28].mxu0  ;;  %v1092_v4 = vmul.f32 0.125, %v959_v7  ;;  %v1155_v44 = vsub.f32 %v1091_v57, %v1123_v27 }
 0x218   : > { %v1383_v23 = vadd.f32 %v2773_v49, %v1345_v53  ;;  %v1346_v62 = vmul.f32 %v2753_v8, %v1308_v61  ;;  %v718_v35 = vpop.f32.mrb[31].mxu1  ;;  %v972_v17 = vpop.f32.mrb[29].mxu0  ;;  %v1253_v63 = vadd.f32 1e-05, %v1189_v34  ;;  %v2804_v3 = vmul.f32 0.125, %v1890_v21 }
 0x219   : > { %1417 = vst.msk [vmem:[%s2799_s25 + $0x10] sm:$0xff] %vm341_vm0, %v1385_v56  ;;  %v1386_v31 = vadd.f32 %v2773_v49, %v1348_v32  ;;  %v1927_v53 = vpop.f32.mrb[30].mxu0  ;;  %v1158_v7 = vsub.f32 %v1094_v6, %v1126_v1  ;;  %v1156_v61 = vsub.f32 %v1092_v4, %v1124_v26  ;;  %v2809_v47 = vmul.f32 0.125, %v715_v33 }
 0x21a   : > { %1415 = vst.msk [vmem:[%s2799_s25] sm:$0xff] %vm341_vm0, %v1383_v23  ;;  %v1384_v51 = vadd.f32 %v2773_v49, %v1346_v62  ;;  %v975_v52 = vpop.f32.mrb[31].mxu0  ;;  %2057 = vrsqrt.f32 %v1253_v63  ;;  %v1187_v56 = vmax.f32 %v1155_v44, 0.0  ;;  %v1129_v32 = vmul.f32 %v2804_v3, %v2804_v3 }
 0x21b   : > { %1418 = vst.msk [vmem:[%s2799_s25 + $0x18] sm:$0xff] %vm341_vm0, %v1386_v31  ;;  %v2050_v21 = vpop.eup %2049  ;;  %v1190_v34 = vmax.f32 %v1158_v7, 0.0  ;;  %v1188_v57 = vmax.f32 %v1156_v61, 0.0  ;;  %v1127_v1 = vmul.f32 %v2809_v47, %v2809_v47  ;;  %v3330_v23 = vsub.f32 %v2506_v12, %v2719_v11 }
 0x21c   : > { %1416 = vst.msk [vmem:[%s2799_s25 + $0x8] sm:$0xff] %vm341_vm0, %v1384_v51  ;;  %v2052_v33 = vpop.eup %2051  ;;  %v1251_v6 = vadd.f32 1e-05, %v1187_v56  ;;  %v2826_v4 = vmul.f32 0.125, %v1891_v28  ;;  %v1097_v31 = vmul.f32 0.125, %v1926_v41  ;;  %v3331_v51 = vsub.f32 %v2509_v13, %v2721_v10 }
 0x21d   : > { %v1313_v62 = vmul.f32 %v2050_v21, %v3330_v23  ;;  %v1894_v63 = vpop.f32.mrb[32].mxu1  ;;  %v2054_v44 = vpop.eup %2053  ;;  %v1254_v61 = vadd.f32 1e-05, %v1190_v34  ;;  %v1252_v27 = vadd.f32 1e-05, %v1188_v57  ;;  %v2831_v45 = vmul.f32 0.125, %v718_v35 }
 0x21e   : > { %v1311_v7 = vmul.f32 %v2052_v33, %v3331_v51  ;;  %v731_v26 = vpop.f32.mrb[33].mxu1  ;;  %v2056_v30 = vpop.eup %2055  ;;  %v3332_v12 = vsub.f32 %v2516_v16, %v2731_v55  ;;  %2059 = vrsqrt.f32 %v1251_v6  ;;  %v1130_v28 = vmul.f32 %v2826_v4, %v2826_v4 }
 0x21f   : > { %v1351_v20 = vmul.f32 %v2753_v8, %v1313_v62  ;;  %v1895_v41 = vpop.f32.mrb[34].mxu1  ;;  %v1930_v56 = vpop.f32.mrb[32].mxu0  ;;  %v3333_v10 = vsub.f32 %v2530_v22, %v2733_v2  ;;  %2061 = vrsqrt.f32 %v1254_v61  ;;  %v1226_v21 = vsub.f32 %v2619_v25, %v2826_v4 }
 0x220   : > { %v1314_v11 = vmul.f32 %v2054_v44, %v3332_v12  ;;  %v1349_v13 = vmul.f32 %v2753_v8, %v1311_v7  ;;  %v734_v34 = vpop.f32.mrb[35].mxu1  ;;  %v988_v16 = vpop.f32.mrb[33].mxu0  ;;  %2063 = vrsqrt.f32 %v1252_v27  ;;  %v1161_v33 = vsub.f32 %v1097_v31, %v1129_v32 }
 0x221   : > { %v1312_v35 = vmul.f32 %v2056_v30, %v3333_v10  ;;  %v1389_v55 = vadd.f32 %v2773_v49, %v1351_v20  ;;  %v2847_v23 = vpop.f32.mrb[34].mxu0  ;;  %v1128_v30 = vmul.f32 %v2831_v45, %v2831_v45  ;;  %v1095_v27 = vmul.f32 0.125, %v972_v17 }
 0x222   : > { %v1352_v57 = vmul.f32 %v2753_v8, %v1314_v11  ;;  %v1387_v62 = vadd.f32 %v2773_v49, %v1349_v13  ;;  %v2855_v6 = vpop.f32.mrb[35].mxu0  ;;  %v1193_v32 = vmax.f32 %v1161_v33, 0.0  ;;  %v1098_v31 = vmul.f32 0.125, %v1927_v53 }
 0x223   : > { %v1350_v22 = vmul.f32 %v2753_v8, %v1312_v35  ;;  %1421 = vst.msk [vmem:[%s2799_s25 + $0x30] sm:$0xff] %vm341_vm0, %v1389_v55  ;;  %v1096_v51 = vmul.f32 0.125, %v975_v52  ;;  %v2863_v7 = vmul.f32 0.125, %v1894_v63  ;;  %v2865_v61 = vmul.f32 0.125, %v731_v26 }
 0x224   : > { %v1390_v20 = vadd.f32 %v2773_v49, %v1352_v57  ;;  %1419 = vst.msk [vmem:[%s2799_s25 + $0x20] sm:$0xff] %vm341_vm0, %v1387_v62  ;;  %v2058_v12 = vpop.eup %2057  ;;  %v1257_v11 = vadd.f32 1e-05, %v1193_v32  ;;  %v1159_v13 = vsub.f32 %v1095_v27, %v1127_v1  ;;  %v1162_v10 = vsub.f32 %v1098_v31, %v1130_v28 }
 0x225   : > { %v1388_v44 = vadd.f32 %v2773_v49, %v1350_v22  ;;  %v2869_v35 = vmul.f32 0.125, %v1895_v41  ;;  %v1898_v55 = vpop.f32.mrb[36].mxu1  ;;  %v3334_v17 = vsub.f32 %v2562_v36, %v2743_v50  ;;  %v1160_v52 = vsub.f32 %v1096_v51, %v1128_v30 }
 0x226   : > { %1422 = vst.msk [vmem:[%s2799_s25 + $0x38] sm:$0xff] %vm341_vm0, %v1390_v20  ;;  %v1133_v26 = vmul.f32 %v2863_v7, %v2863_v7  ;;  %v747_v57 = vpop.f32.mrb[37].mxu1  ;;  %2065 = vrsqrt.f32 %v1257_v11  ;;  %v1191_v1 = vmax.f32 %v1159_v13, 0.0  ;;  %v1194_v28 = vmax.f32 %v1162_v10, 0.0 }
 0x227   : > { %1420 = vst.msk [vmem:[%s2799_s25 + $0x28] sm:$0xff] %vm341_vm0, %v1388_v44  ;;  %v1317_v53 = vmul.f32 %v2058_v12, %v3334_v17  ;;  %v1131_v41 = vmul.f32 %v2865_v61, %v2865_v61  ;;  %v2882_v33 = vpop.f32.mrb[38].mxu1  ;;  %v2884_v62 = vpop.f32.mrb[36].mxu0  ;;  %v1192_v50 = vmax.f32 %v1160_v52, 0.0  ;;  %v1134_v30 = vmul.f32 %v2869_v35, %v2869_v35 }
 0x228   : > { %v2891_v20 = vpop.f32.mrb[39].mxu1  ;;  %v2893_v32 = vpop.f32.mrb[37].mxu0  ;;  %v1255_v31 = vadd.f32 1e-05, %v1191_v1  ;;  %v1258_v44 = vadd.f32 1e-05, %v1194_v28  ;;  %v3335_v17 = vsub.f32 %v2565_v37, %v2746_v9  ;;  %v3336_v28 = vsub.f32 %v2572_v40, %v2761_v39 }
 0x229   : > { %v1355_v36 = vmul.f32 %v2753_v8, %v1317_v53  ;;  %v2060_v27 = vpop.eup %2059  ;;  %v1101_v12 = vmul.f32 0.125, %v1930_v56  ;;  %v2897_v11 = vpop.f32.mrb[38].mxu0  ;;  %v1256_v52 = vadd.f32 1e-05, %v1192_v50  ;;  %v2903_v22 = vmul.f32 0.125, %v734_v34 }
 0x22a   : > { %v2062_v13 = vpop.eup %2061  ;;  %v1315_v53 = vmul.f32 %v2060_v27, %v3335_v17  ;;  %v2905_v63 = vpop.f32.mrb[39].mxu0  ;;  %2067 = vrsqrt.f32 %v1255_v31  ;;  %v1099_v2 = vmul.f32 0.125, %v988_v16  ;;  %v3337_v37 = vsub.f32 %v2586_v46, %v2768_v60 }
 0x22b   : > { %v1393_v10 = vadd.f32 %v2773_v49, %v1355_v36  ;;  %v2064_v1 = vpop.eup %2063  ;;  %v1318_v51 = vmul.f32 %v2062_v13, %v3336_v28  ;;  %v1165_v56 = vsub.f32 %v1101_v12, %v1133_v26  ;;  %2069 = vrsqrt.f32 %v1258_v44 }
 0x22c   : > { %v1353_v36 = vmul.f32 %v2753_v8, %v1315_v53  ;;  %v1316_v9 = vmul.f32 %v2064_v1, %v3337_v37  ;;  %v1132_v34 = vmul.f32 %v2903_v22, %v2903_v22  ;;  %2071 = vrsqrt.f32 %v1256_v52 }
 0x22d   : > { %1425 = vst.msk [vmem:[%s2799_s25 + $0x50] sm:$0xff] %vm341_vm0, %v1393_v10  ;;  %v1356_v50 = vmul.f32 %v2753_v8, %v1318_v51  ;;  %v1197_v40 = vmax.f32 %v1165_v56, 0.0  ;;  %v1228_v39 = vsub.f32 %v2492_v5, %v2903_v22  ;;  %v2921_v16 = vpop.f32.mrb[40].mxu1  ;;  %v1163_v46 = vsub.f32 %v1099_v2, %v1131_v41 }
 0x22e   : > { %v1391_v26 = vadd.f32 %v2773_v49, %v1353_v36  ;;  %v1354_v27 = vmul.f32 %v2753_v8, %v1316_v9  ;;  %v1102_v60 = vmul.f32 0.125, %v2847_v23  ;;  %v2926_v31 = vpop.f32.mrb[41].mxu1  ;;  %v1100_v12 = vmul.f32 0.125, %v2855_v6 }
 0x22f   : > { %v1394_v44 = vadd.f32 %v2773_v49, %v1356_v50  ;;  %v1261_v51 = vadd.f32 1e-05, %v1197_v40  ;;  %v2930_v13 = vmul.f32 0.125, %v1898_v55  ;;  %v2932_v10 = vpop.f32.mrb[42].mxu1  ;;  %v2934_v17 = vpop.f32.mrb[40].mxu0  ;;  %v1195_v23 = vmax.f32 %v1163_v46, 0.0 }
 0x230   : > { %1423 = vst.msk [vmem:[%s2799_s25 + $0x40] sm:$0xff] %vm341_vm0, %v1391_v26  ;;  %v1392_v2 = vadd.f32 %v2773_v49, %v1354_v27  ;;  %v1166_v41 = vsub.f32 %v1102_v60, %v1134_v30  ;;  %v2939_v53 = vmul.f32 0.125, %v747_v57  ;;  %v2941_v52 = vpop.f32.mrb[43].mxu1  ;;  %v2943_v1 = vpop.f32.mrb[41].mxu0  ;;  %v1164_v55 = vsub.f32 %v1100_v12, %v1132_v34 }
 0x231   : > { %v2066_v6 = vpop.eup %2065  ;;  %1426 = vst.msk [vmem:[%s2799_s25 + $0x58] sm:$0xff] %vm341_vm0, %v1394_v44  ;;  %2073 = vrsqrt.f32 %v1261_v51  ;;  %v1137_v28 = vmul.f32 %v2930_v13, %v2930_v13  ;;  %v1233_v56 = vsub.f32 %v2512_v14, %v2930_v13  ;;  %v2951_v36 = vpop.f32.mrb[42].mxu0  ;;  %v3338_v57 = vsub.f32 %v2609_v15, %v2804_v3  ;;  %v3344_v13 = vld [vmem:[#allocation9_spill] sm:$0xff] }
 0x232   : > { %1424 = vst.msk [vmem:[%s2799_s25 + $0x48] sm:$0xff] %vm341_vm0, %v1392_v2  ;;  %v1259_v37 = vadd.f32 1e-05, %v1195_v23  ;;  %v1198_v9 = vmax.f32 %v1166_v41, 0.0  ;;  %v1135_v50 = vmul.f32 %v2939_v53, %v2939_v53  ;;  %v2960_v34 = vpop.f32.mrb[43].mxu0  ;;  %v1196_v40 = vmax.f32 %v1164_v55, 0.0 }
 0x233   : > { %v1321_v30 = vmul.f32 %v2066_v6, %v3338_v57  ;;  %v1231_v26 = vsub.f32 %v2522_v18, %v2939_v53  ;;  %v2965_v27 = vmul.f32 0.125, %v2882_v33  ;;  %v1105_v46 = vmul.f32 0.125, %v2884_v62 }
 0x234   : > { %2075 = vrsqrt.f32 %v1259_v37  ;;  %v1262_v15 = vadd.f32 1e-05, %v1198_v9  ;;  %v2970_v3 = vmul.f32 0.125, %v2891_v20  ;;  %v2068_v44 = vpop.eup %2067  ;;  %v1260_v51 = vadd.f32 1e-05, %v1196_v40 }
 0x235   : > { %v1359_v60 = vmul.f32 %v2753_v8, %v1321_v30  ;;  %v1138_v12 = vmul.f32 %v2965_v27, %v2965_v27  ;;  %v1234_v2 = vsub.f32 %v2536_v24, %v2965_v27  ;;  %v1169_v33 = vsub.f32 %v1105_v46, %v1137_v28  ;;  %v2976_v23 = vpop.f32.mrb[44].mxu1  ;;  %v2070_v62 = vpop.eup %2069 }
 0x236   : > { %v3339_v6 = vsub.f32 %v2612_v19, %v2809_v47  ;;  %2077 = vrsqrt.f32 %v1262_v15  ;;  %v1136_v55 = vmul.f32 %v2970_v3, %v2970_v3  ;;  %v2984_v57 = vpop.f32.mrb[45].mxu1  ;;  %v2072_v30 = vpop.eup %2071  ;;  %v1322_v28 = vmul.f32 %v2070_v62, %v1226_v21 }
 0x237   : > { %v1397_v41 = vadd.f32 %v2773_v49, %v1359_v60  ;;  %2079 = vrsqrt.f32 %v1260_v51  ;;  %v1201_v37 = vmax.f32 %v1169_v33, 0.0  ;;  %v1232_v9 = vsub.f32 %v2548_v29, %v2970_v3  ;;  %v2991_v40 = vpop.f32.mrb[46].mxu1  ;;  %v2993_v19 = vpop.f32.mrb[44].mxu0 }
 0x238   : > { %v1319_v20 = vmul.f32 %v2068_v44, %v3339_v6  ;;  %v3340_v46 = vsub.f32 %v2631_v43, %v2831_v45  ;;  %v1103_v25 = vmul.f32 0.125, %v2893_v32  ;;  %v1106_v4 = vmul.f32 0.125, %v2897_v11  ;;  %v3003_v21 = vpop.f32.mrb[47].mxu1  ;;  %v3005_v15 = vpop.f32.mrb[45].mxu0 }
 0x239   : > { %1429 = vst.msk [vmem:[%s2799_s25 + $0x70] sm:$0xff] %vm341_vm0, %v1397_v41  ;;  %v1360_v44 = vmul.f32 %v2753_v8, %v1322_v28  ;;  %v1265_v51 = vadd.f32 1e-05, %v1201_v37  ;;  %v1104_v33 = vmul.f32 0.125, %v2905_v63  ;;  %v3010_v62 = vmul.f32 0.125, %v2921_v16  ;;  %v3012_v41 = vpop.f32.mrb[46].mxu0 }
 0x23a   : > { %v1357_v47 = vmul.f32 %v2753_v8, %v1319_v20  ;;  %v1320_v60 = vmul.f32 %v2072_v30, %v3340_v46  ;;  %v1167_v32 = vsub.f32 %v1103_v25, %v1135_v50  ;;  %v1170_v11 = vsub.f32 %v1106_v4, %v1138_v12  ;;  %v3016_v6 = vpop.f32.mrb[47].mxu0 }
 0x23b   : > { %v2074_v20 = vpop.eup %2073  ;;  %v1398_v30 = vadd.f32 %v2773_v49, %v1360_v44  ;;  %2081 = vrsqrt.f32 %v1265_v51  ;;  %v1168_v63 = vsub.f32 %v1104_v33, %v1136_v55  ;;  %v1141_v16 = vmul.f32 %v3010_v62, %v3010_v62 }
 0x23c   : > { %v1395_v43 = vadd.f32 %v2773_v49, %v1357_v47  ;;  %v1358_v45 = vmul.f32 %v2753_v8, %v1320_v60  ;;  %v3341_v37 = vsub.f32 %v2456_v54, %v2863_v7  ;;  %v1199_v12 = vmax.f32 %v1167_v32, 0.0 }
 0x23d   : > { %v1202_v47 = vmax.f32 %v1170_v11, 0.0  ;;  %1430 = vst.msk [vmem:[%s2799_s25 + $0x78] sm:$0xff] %vm341_vm0, %v1398_v30  ;;  %v1200_v46 = vmax.f32 %v1168_v63, 0.0  ;;  %v1237_v60 = vsub.f32 %v2568_v38, %v3010_v62  ;;  %v3032_v55 = vmul.f32 0.125, %v2926_v31 }
 0x23e   : > { %1427 = vst.msk [vmem:[%s2799_s25 + $0x60] sm:$0xff] %vm341_vm0, %v1395_v43  ;;  %v1396_v28 = vadd.f32 %v2773_v49, %v1358_v45  ;;  %v1325_v50 = vmul.f32 %v2074_v20, %v3341_v37  ;;  %v3035_v25 = vmul.f32 0.125, %v2932_v10  ;;  %v2076_v4 = vpop.eup %2075  ;;  %v1263_v7 = vadd.f32 1e-05, %v1199_v12 }
 0x23f   : > { %v1266_v44 = vadd.f32 1e-05, %v1202_v47  ;;  %v1109_v51 = vmul.f32 0.125, %v2934_v17  ;;  %v3342_v33 = vsub.f32 %v2466_v58, %v2865_v61  ;;  %v1264_v45 = vadd.f32 1e-05, %v1200_v46 }
 0x240   : > { %1428 = vst.msk [vmem:[%s2799_s25 + $0x68] sm:$0xff] %vm341_vm0, %v1396_v28  ;;  %v1363_v54 = vmul.f32 %v2753_v8, %v1325_v50  ;;  %v1139_v31 = vmul.f32 %v3032_v55, %v3032_v55  ;;  %v1235_v10 = vsub.f32 %v2578_v42, %v3032_v55  ;;  %v2078_v32 = vpop.eup %2077  ;;  %2083 = vrsqrt.f32 %v1263_v7 }
 0x241   : > { %v1323_v43 = vmul.f32 %v2076_v4, %v3342_v33  ;;  %v1142_v20 = vmul.f32 %v3035_v25, %v3035_v25  ;;  %v1238_v17 = vsub.f32 %v2590_v48, %v3035_v25  ;;  %v2080_v30 = vpop.eup %2079  ;;  %v3343_v61 = vsub.f32 %v2480_v0, %v2869_v35 }
 0x242   : > { %v1401_v11 = vadd.f32 %v2773_v49, %v1363_v54  ;;  %2085 = vrsqrt.f32 %v1266_v44  ;;  %v1173_v28 = vsub.f32 %v1109_v51, %v1141_v16  ;;  %v1324_v37 = vmul.f32 %v2080_v30, %v1228_v39 }
 0x243   : > { %v1361_v58 = vmul.f32 %v2753_v8, %v1323_v43  ;;  %v1326_v63 = vmul.f32 %v2078_v32, %v3343_v61  ;;  %2087 = vrsqrt.f32 %v1264_v45  ;;  %v3063_v50 = vmul.f32 0.125, %v2941_v52 }
 0x244   : > { %1433 = vst.msk [vmem:[%s2799_s25 + $0x90] sm:$0xff] %vm341_vm0, %v1401_v11  ;;  %v1107_v12 = vmul.f32 0.125, %v2943_v1  ;;  %v1205_v35 = vmax.f32 %v1173_v28, 0.0  ;;  %v1110_v16 = vmul.f32 0.125, %v2951_v36  ;;  %v1362_v46 = vmul.f32 %v2753_v8, %v1324_v37 }
 0x245   : > { %v1399_v47 = vadd.f32 %v2773_v49, %v1361_v58  ;;  %v1364_v0 = vmul.f32 %v2753_v8, %v1326_v63  ;;  %v1140_v5 = vmul.f32 %v3063_v50, %v3063_v50  ;;  %v1236_v22 = vsub.f32 %v2600_v59, %v3063_v50  ;;  %v2082_v52 = vpop.eup %2081 }
 0x246   : > { %v1171_v39 = vsub.f32 %v1107_v12, %v1139_v31  ;;  %v1269_v4 = vadd.f32 1e-05, %v1205_v35  ;;  %v1174_v54 = vsub.f32 %v1110_v16, %v1142_v20  ;;  %v1108_v7 = vmul.f32 0.125, %v2960_v34  ;;  %v3346_v16 = vld [vmem:[#allocation11_spill] sm:$0xff] }
 0x247   : > { %1431 = vst.msk [vmem:[%s2799_s25 + $0x80] sm:$0xff] %vm341_vm0, %v1399_v47  ;;  %v1402_v1 = vadd.f32 %v2773_v49, %v1364_v0  ;;  %v1400_v36 = vadd.f32 %v2773_v49, %v1362_v46  ;;  %v1329_v44 = vmul.f32 %v2082_v52, %v1233_v56  ;;  %v3083_v33 = vmul.f32 0.125, %v2976_v23 }
 0x248   : > { %v1203_v51 = vmax.f32 %v1171_v39, 0.0  ;;  %2089 = vrsqrt.f32 %v1269_v4  ;;  %v1206_v43 = vmax.f32 %v1174_v54, 0.0  ;;  %v1172_v45 = vsub.f32 %v1108_v7, %v1140_v5 }
 0x249   : > { %1434 = vst.msk [vmem:[%s2799_s25 + $0x98] sm:$0xff] %vm341_vm0, %v1402_v1  ;;  %v3088_v31 = vmul.f32 0.125, %v2984_v57  ;;  %1432 = vst.msk [vmem:[%s2799_s25 + $0x88] sm:$0xff] %vm341_vm0, %v1400_v36  ;;  %v1367_v34 = vmul.f32 %v2753_v8, %v1329_v44  ;;  %v1145_v14 = vmul.f32 %v3083_v33, %v3083_v33  ;;  %v1241_v56 = vsub.f32 %v3344_v13, %v3083_v33  ;;  %v3345_v57 = vld [vmem:[#allocation10_spill] sm:$0xff] }
 0x24a   : > { %v1267_v32 = vadd.f32 1e-05, %v1203_v51  ;;  %v1270_v23 = vadd.f32 1e-05, %v1206_v43  ;;  %v1204_v11 = vmax.f32 %v1172_v45, 0.0  ;;  %v2084_v58 = vpop.eup %2083  ;;  %v3103_v63 = vmul.f32 0.125, %v2991_v40 }
 0x24b   : > { %v1143_v20 = vmul.f32 %v3088_v31, %v3088_v31  ;;  %v1239_v30 = vsub.f32 %v3345_v57, %v3088_v31  ;;  %v1405_v61 = vadd.f32 %v2773_v49, %v1367_v34  ;;  %v1113_v28 = vmul.f32 0.125, %v2993_v19  ;;  %v1553_v57 = vld [vmem:[%s2799_s25 + $0x10] sm:$0xff] (%p3348_p7) }
 0x24c   : > { %2091 = vrsqrt.f32 %v1267_v32  ;;  %v2086_v37 = vpop.eup %2085  ;;  %v1327_v12 = vmul.f32 %v2084_v58, %v1231_v26  ;;  %v1268_v47 = vadd.f32 1e-05, %v1204_v11  ;;  %v3110_v0 = vmul.f32 0.125, %v3003_v21  ;;  %1554 = vst [vmem:[%s3209_s28 + $0x40] sm:$0xff] (%p3348_p7), %v1553_v57 }
 0x24d   : > { %2093 = vrsqrt.f32 %v1270_v23  ;;  %v2088_v35 = vpop.eup %2087  ;;  %1437 = vst.msk [vmem:[%s2799_s25 + $0xb0] sm:$0xff] %vm341_vm0, %v1405_v61  ;;  %v1330_v40 = vmul.f32 %v2086_v37, %v1234_v2  ;;  %v1146_v19 = vmul.f32 %v3103_v63, %v3103_v63  ;;  %v1242_v46 = vsub.f32 %v3346_v16, %v3103_v63  ;;  %v3347_v2 = vld [vmem:[#allocation12_spill] sm:$0xff]  ;;  %v1559_v16 = vld [vmem:[%s2799_s25 + $0x28] sm:$0xff] (%p3348_p7) }
 0x24e   : > { %v1177_v18 = vsub.f32 %v1113_v28, %v1145_v14  ;;  %v1365_v53 = vmul.f32 %v2753_v8, %v1327_v12  ;;  %v1328_v26 = vmul.f32 %v2088_v35, %v1232_v9  ;;  %2095 = vrsqrt.f32 %v1268_v47  ;;  %1560 = vst [vmem:[%s3209_s28 + $0x88] sm:$0xff] (%p3348_p7), %v1559_v16 }
 0x24f   : > { %v1144_v21 = vmul.f32 %v3110_v0, %v3110_v0  ;;  %v1368_v24 = vmul.f32 %v2753_v8, %v1330_v40  ;;  %v1240_v5 = vsub.f32 %v3347_v2, %v3110_v0  ;;  %v1111_v39 = vmul.f32 0.125, %v3005_v15  ;;  %v1575_v2 = vld [vmem:[%s2799_s25 + $0x68] sm:$0xff] (%p3348_p7) }
 0x250   : > { %v1209_v27 = vmax.f32 %v1177_v18, 0.0  ;;  %v1403_v52 = vadd.f32 %v2773_v49, %v1365_v53  ;;  %v1366_v29 = vmul.f32 %v2753_v8, %v1328_v26  ;;  %v1114_v3 = vmul.f32 0.125, %v3012_v41  ;;  %v1563_v18 = vld [vmem:[%s2799_s25 + $0x38] sm:$0xff] (%p3348_p7)  ;;  %v1565_v53 = vld [vmem:[%s2799_s25 + $0x40] sm:$0xff] (%p3348_p7)  ;;  %v1567_v26 = vld [vmem:[%s2799_s25 + $0x48] sm:$0xff] (%p3348_p7)  ;;  %1576 = vst [vmem:[%s3209_s28 + $0x188] sm:$0xff] (%p3348_p7), %v1575_v2 }
 0x251   : > { %v1112_v9 = vmul.f32 0.125, %v3016_v6  ;;  %v1406_v1 = vadd.f32 %v2773_v49, %v1368_v24  ;;  %v1175_v54 = vsub.f32 %v1111_v39, %v1143_v20  ;;  %v1571_v24 = vld [vmem:[%s2799_s25 + $0x58] sm:$0xff] (%p3348_p7)  ;;  %1564 = vst [vmem:[%s3209_s28 + $0xc8] sm:$0xff] (%p3348_p7), %v1563_v18  ;;  %1566 = vst [vmem:[%s3209_s28 + $0x100] sm:$0xff] (%p3348_p7), %v1565_v53 }
 0x252   : > { %v1273_v4 = vadd.f32 1e-05, %v1209_v27  ;;  %v2090_v7 = vpop.eup %2089  ;;  %1435 = vst.msk [vmem:[%s2799_s25 + $0xa0] sm:$0xff] %vm341_vm0, %v1403_v52  ;;  %v1404_v36 = vadd.f32 %v2773_v49, %v1366_v29  ;;  %v1178_v44 = vsub.f32 %v1114_v3, %v1146_v19  ;;  %v1557_v19 = vld [vmem:[%s2799_s25 + $0x20] sm:$0xff] (%p3348_p7)  ;;  %1568 = vst [vmem:[%s3209_s28 + $0x108] sm:$0xff] (%p3348_p7), %v1567_v26  ;;  %v1579_v39 = vld [vmem:[%s2799_s25 + $0x78] sm:$0xff] (%p3348_p7) }
 0x253   : > { %v1176_v15 = vsub.f32 %v1112_v9, %v1144_v21  ;;  %1438 = vst.msk [vmem:[%s2799_s25 + $0xb8] sm:$0xff] %vm341_vm0, %v1406_v1  ;;  %v1333_v51 = vmul.f32 %v2090_v7, %v1237_v60  ;;  %v1207_v41 = vmax.f32 %v1175_v54, 0.0  ;;  %v1569_v21 = vld [vmem:[%s2799_s25 + $0x50] sm:$0xff] (%p3348_p7)  ;;  %1558 = vst [vmem:[%s3209_s28 + $0x80] sm:$0xff] (%p3348_p7), %v1557_v19  ;;  %v1573_v27 = vld [vmem:[%s2799_s25 + $0x60] sm:$0xff] (%p3348_p7) }
 0x254   : > { %2097 = vrsqrt.f32 %v1273_v4  ;;  %1436 = vst.msk [vmem:[%s2799_s25 + $0xa8] sm:$0xff] %vm341_vm0, %v1404_v36  ;;  %v1210_v6 = vmax.f32 %v1178_v44, 0.0  ;;  %1570 = vst [vmem:[%s3209_s28 + $0x140] sm:$0xff] (%p3348_p7), %v1569_v21  ;;  %v1581_v52 = vld [vmem:[%s2799_s25 + $0x80] sm:$0xff] (%p3348_p7)  ;;  %v1583_v29 = vld [vmem:[%s2799_s25 + $0x88] sm:$0xff] (%p3348_p7) }
 0x255   : > { %v1208_v43 = vmax.f32 %v1176_v15, 0.0  ;;  %v1371_v34 = vmul.f32 %v2753_v8, %v1333_v51  ;;  %v1271_v32 = vadd.f32 1e-05, %v1207_v41  ;;  %1572 = vst [vmem:[%s3209_s28 + $0x148] sm:$0xff] (%p3348_p7), %v1571_v24  ;;  %1574 = vst [vmem:[%s3209_s28 + $0x180] sm:$0xff] (%p3348_p7), %v1573_v27  ;;  %v1585_v3 = vld [vmem:[%s2799_s25 + $0x90] sm:$0xff] (%p3348_p7) }
 0x256   : > { %v2092_v45 = vpop.eup %2091  ;;  %v1274_v11 = vadd.f32 1e-05, %v1210_v6  ;;  %1580 = vst [vmem:[%s3209_s28 + $0x1c8] sm:$0xff] (%p3348_p7), %v1579_v39  ;;  %1582 = vst [vmem:[%s3209_s28 + $0x200] sm:$0xff] (%p3348_p7), %v1581_v52  ;;  %v1587_v9 = vld [vmem:[%s2799_s25 + $0x98] sm:$0xff] (%p3348_p7)  ;;  %v1593_v54 = vld [vmem:[%s2799_s25 + $0xb0] sm:$0xff] (%p3348_p7) }
 0x257   : > { %v2094_v14 = vpop.eup %2093  ;;  %v1331_v23 = vmul.f32 %v2092_v45, %v1235_v10  ;;  %v1272_v38 = vadd.f32 1e-05, %v1208_v43  ;;  %v1409_v62 = vadd.f32 %v2773_v49, %v1371_v34  ;;  %2099 = vrsqrt.f32 %v1271_v32  ;;  %1584 = vst [vmem:[%s3209_s28 + $0x208] sm:$0xff] (%p3348_p7), %v1583_v29  ;;  %1586 = vst [vmem:[%s3209_s28 + $0x240] sm:$0xff] (%p3348_p7), %v1585_v3 }
 0x258   : > { %v1334_v60 = vmul.f32 %v2094_v14, %v1238_v17  ;;  %v2096_v20 = vpop.eup %2095  ;;  %2101 = vrsqrt.f32 %v1274_v11  ;;  %1588 = vst [vmem:[%s3209_s28 + $0x248] sm:$0xff] (%p3348_p7), %v1587_v9  ;;  %1594 = vst [vmem:[%s3209_s28 + $0x2c0] sm:$0xff] (%p3348_p7), %v1593_v54 }
 0x259   : > { %v1369_v58 = vmul.f32 %v2753_v8, %v1331_v23  ;;  %1441 = vst.msk [vmem:[%s2799_s25 + $0xd0] sm:$0xff] %vm341_vm0, %v1409_v62  ;;  %v1332_v55 = vmul.f32 %v2096_v20, %v1236_v22  ;;  %2103 = vrsqrt.f32 %v1272_v38  ;;  %v1589_v1 = vld [vmem:[%s2799_s25 + $0xa0] sm:$0xff] (%p3348_p7) }
 0x25a   : > { %v1372_v42 = vmul.f32 %v2753_v8, %v1334_v60  ;;  %1590 = vst [vmem:[%s3209_s28 + $0x280] sm:$0xff] (%p3348_p7), %v1589_v1  ;;  %v1595_v7 = vld [vmem:[%s2799_s25 + $0xb8] sm:$0xff] (%p3348_p7) }
 0x25b   : > { %v1407_v10 = vadd.f32 %v2773_v49, %v1369_v58  ;;  %v1370_v25 = vmul.f32 %v2753_v8, %v1332_v55  ;;  %v1591_v4 = vld [vmem:[%s2799_s25 + $0xa8] sm:$0xff] (%p3348_p7)  ;;  %1596 = vst [vmem:[%s3209_s28 + $0x2c8] sm:$0xff] (%p3348_p7), %v1595_v7 }
 0x25c   : > { %v1410_v48 = vadd.f32 %v2773_v49, %v1372_v42  ;;  %1592 = vst [vmem:[%s3209_s28 + $0x288] sm:$0xff] (%p3348_p7), %v1591_v4 }
 0x25d   : > { %1439 = vst.msk [vmem:[%s2799_s25 + $0xc0] sm:$0xff] %vm341_vm0, %v1407_v10  ;;  %v1408_v61 = vadd.f32 %v2773_v49, %v1370_v25 }
 0x25e   : > { %v2098_v17 = vpop.eup %2097  ;;  %1442 = vst.msk [vmem:[%s2799_s25 + $0xd8] sm:$0xff] %vm341_vm0, %v1410_v48 }
 0x25f   : > { %v1337_v59 = vmul.f32 %v2098_v17, %v1241_v56  ;;  %1440 = vst.msk [vmem:[%s2799_s25 + $0xc8] sm:$0xff] %vm341_vm0, %v1408_v61 }
 0x260   : > { %v1601_v15 = vld [vmem:[%s2799_s25 + $0xd0] sm:$0xff] (%p3348_p7) }
 0x261   : > { %v1375_v50 = vmul.f32 %v2753_v8, %v1337_v59  ;;  %v2100_v22 = vpop.eup %2099  ;;  %1602 = vst [vmem:[%s3209_s28 + $0x340] sm:$0xff] (%p3348_p7), %v1601_v15 }
 0x262   : > { %v2102_v63 = vpop.eup %2101  ;;  %v1335_v37 = vmul.f32 %v2100_v22, %v1239_v30  ;;  %v1555_v30 = vld [vmem:[%s2799_s25 + $0x18] sm:$0xff] (%p3348_p7) }
 0x263   : > { %v1413_v28 = vadd.f32 %v2773_v49, %v1375_v50  ;;  %v2104_v12 = vpop.eup %2103  ;;  %v1338_v47 = vmul.f32 %v2102_v63, %v1242_v46  ;;  %v1561_v46 = vld [vmem:[%s2799_s25 + $0x30] sm:$0xff] (%p3348_p7)  ;;  %1556 = vst [vmem:[%s3209_s28 + $0x48] sm:$0xff] (%p3348_p7), %v1555_v30 }
 0x264   : > { %v1373_v33 = vmul.f32 %v2753_v8, %v1335_v37  ;;  %v1336_v13 = vmul.f32 %v2104_v12, %v1240_v5  ;;  %1453 = sbr.rel (!%p3348_p7) target bundleno = 627 (0x273), region = 48  ;;  %1562 = vst [vmem:[%s3209_s28 + $0xc0] sm:$0xff] (%p3348_p7), %v1561_v46  ;;  %v1577_v5 = vld [vmem:[%s2799_s25 + $0x70] sm:$0xff] (%p3348_p7)  ;;  %v1597_v36 = vld [vmem:[%s2799_s25 + $0xc0] sm:$0xff] (%p3348_p7) }
 0x265   : > { %1445 = vst.msk [vmem:[%s2799_s25 + $0xf0] sm:$0xff] %vm341_vm0, %v1413_v28  ;;  %v1376_v56 = vmul.f32 %v2753_v8, %v1338_v47  ;;  %1578 = vst [vmem:[%s3209_s28 + $0x1c0] sm:$0xff] (%p3348_p7), %v1577_v5  ;;  %v1603_v51 = vld [vmem:[%s2799_s25 + $0xd8] sm:$0xff] (%p3348_p7) }
 0x266   : > { %v1411_v0 = vadd.f32 %v2773_v49, %v1373_v33  ;;  %v1374_v35 = vmul.f32 %v2753_v8, %v1336_v13  ;;  %v1549_v8 = vld [vmem:[%s2799_s25] sm:$0xff] (%p3348_p7)  ;;  %v1599_v44 = vld [vmem:[%s2799_s25 + $0xc8] sm:$0xff] (%p3348_p7)  ;;  %1598 = vst [vmem:[%s3209_s28 + $0x300] sm:$0xff] (%p3348_p7), %v1597_v36  ;;  %1604 = vst [vmem:[%s3209_s28 + $0x348] sm:$0xff] (%p3348_p7), %v1603_v51 }
 0x267   : > { %v1414_v40 = vadd.f32 %v2773_v49, %v1376_v56  ;;  %1550 = vst [vmem:[%s3209_s28] sm:$0xff] (%p3348_p7), %v1549_v8  ;;  %1600 = vst [vmem:[%s3209_s28 + $0x308] sm:$0xff] (%p3348_p7), %v1599_v44 }
 0x268   : > { %1443 = vst.msk [vmem:[%s2799_s25 + $0xe0] sm:$0xff] %vm341_vm0, %v1411_v0  ;;  %v1412_v31 = vadd.f32 %v2773_v49, %v1374_v35  ;;  %v1551_v49 = vld [vmem:[%s2799_s25 + $0x8] sm:$0xff] (%p3348_p7) }
 0x269   : > { %1446 = vst.msk [vmem:[%s2799_s25 + $0xf8] sm:$0xff] %vm341_vm0, %v1414_v40  ;;  %1552 = vst [vmem:[%s3209_s28 + $0x8] sm:$0xff] (%p3348_p7), %v1551_v49 }
 0x26a   : > { %1444 = vst.msk [vmem:[%s2799_s25 + $0xe8] sm:$0xff] %vm341_vm0, %v1412_v31 }
 0x26c   : > { %v1609_v43 = vld [vmem:[%s2799_s25 + $0xf0] sm:$0xff] }
 0x26d   : > { %1610 = vst [vmem:[%s3209_s28 + $0x3c0] sm:$0xff] %v1609_v43 }
 0x26f   : > { %v1605_v41 = vld [vmem:[%s2799_s25 + $0xe0] sm:$0xff] }
 0x270   : > { %1606 = vst [vmem:[%s3209_s28 + $0x380] sm:$0xff] %v1605_v41  ;;  %v1611_v45 = vld [vmem:[%s2799_s25 + $0xf8] sm:$0xff] }
 0x271   : > { %v1607_v6 = vld [vmem:[%s2799_s25 + $0xe8] sm:$0xff]  ;;  %1612 = vst [vmem:[%s3209_s28 + $0x3c8] sm:$0xff] %v1611_v45 }
 0x272   : > { %1608 = vst [vmem:[%s3209_s28 + $0x388] sm:$0xff] %v1607_v6 }
 0x273 PF: > { %s18_s27 = sadd.s32 1, %s2217_s27   ;;  %s3349_s23 = sld [smem:[#allocation6_spill]] }
 0x274   : > { %p15_p0 = scmp.ge.s32.totalorder %s18_s27, 10   ;;  %s3350_s25 = sld [smem:[#allocation7_spill]] }
 0x275   : > { %s3351_s30 = sld [smem:[#allocation8_spill]]  ;;  %s3352_s18 = smov %s2185_s19 }
 0x276   : > { %s3353_s19 = smov %s2332_s14  ;;  %s3354_s20 = smov %s2193_s21 }
 0x277   : > { %s3355_s21 = smov %s2197_s22  ;;  %s3356_s22 = smov %s2329_s13 }
 0x278   : > { %s3357_s24 = smov %s2213_s26  ;;  %17 = sbr.rel (!%p15_p0) target bundleno = 6 (0x6), region = 121 }
 0x27b   : > { %s3358_s26 = smov %s3351_s30 }
 0x27f   :  { %1628 = vsyncpa [#allocation3], 1 }
 0x280   :  { %1630 = vsyncpa [#allocation3 + $0x1], 1 }

</bundles_post_ra>
